<compile_context>
chip_gen: v7x
topology: tpu7x:2x2x1
jax: 0.10.0
libtpu: 0.0.40
codegen_flags: <defaults>
</compile_context>

<pallas_src>
import functools

import jax
import jax.numpy as jnp
from jax.experimental import pallas as pl
from jax.experimental.pallas import tpu as pltpu


def _pick_tile(total, target, align):
    """Largest divisor of `total` that is <= target and a multiple of `align`,
    falling back to the full dimension (always a legal block)."""
    best = None
    t = align
    upper = min(total, target)
    while t <= upper:
        if total % t == 0:
            best = t
        t += align
    return best if best is not None else total


# ---------------------------------------------------------------------------
# Kernel 1: conv1 (3x3, 768->256, no bias) as im2col matmul + folded BN + ReLU
#           bf16 operands, f32 accumulation directly in the resident output block.
# ---------------------------------------------------------------------------
def conv_bn_relu_kernel(a_ref, b_ref, bias_ref, o_ref):
    k = pl.program_id(1)

    @pl.when(k == 0)
    def _():
        o_ref[...] = jnp.zeros_like(o_ref)

    o_ref[...] += jnp.dot(a_ref[...], b_ref[...],
                          preferred_element_type=jnp.float32)

    @pl.when(k == pl.num_programs(1) - 1)
    def _():
        o_ref[...] = jnp.maximum(o_ref[...] + bias_ref[...], 0.0)


def conv_bn_relu(patches, w, bias, *, tm_target=512, tk_target=1024):
    M, K = patches.shape
    _, N = w.shape
    tm = _pick_tile(M, tm_target, 8)
    tk = _pick_tile(K, tk_target, 128)
    return pl.pallas_call(
        conv_bn_relu_kernel,
        out_shape=jax.ShapeDtypeStruct((M, N), jnp.float32),
        grid_spec=pltpu.PrefetchScalarGridSpec(
            num_scalar_prefetch=0,
            grid=(M // tm, K // tk),
            in_specs=[
                pl.BlockSpec((tm, tk), lambda i, k: (i, k)),
                pl.BlockSpec((tk, N), lambda i, k: (k, 0)),
                pl.BlockSpec((1, N), lambda i, k: (0, 0)),
            ],
            out_specs=pl.BlockSpec((tm, N), lambda i, k: (i, 0)),
        ),
        compiler_params=pltpu.CompilerParams(
            dimension_semantics=("parallel", "arbitrary")),
    )(patches, w, bias)


# ---------------------------------------------------------------------------
# Kernel 2: ChannelAttention — HW-tiled global avg/max pool + MLP bottleneck + sigmoid
# ---------------------------------------------------------------------------
def channel_att_kernel(x_ref, w1_ref, b1_ref, w2_ref, b2_ref, sig_ref,
                       sum_s, max_s, *, inv_hw):
    i = pl.program_id(1)

    @pl.when(i == 0)
    def _():
        sum_s[...] = jnp.zeros_like(sum_s)
        max_s[...] = jnp.full_like(max_s, -jnp.inf)

    x = x_ref[0]                                                  # (thw, C)
    sum_s[...] += jnp.sum(x, axis=0, keepdims=True)               # (1, C)
    max_s[...] = jnp.maximum(max_s[...], jnp.max(x, axis=0, keepdims=True))

    @pl.when(i == pl.num_programs(1) - 1)
    def _():
        avg = sum_s[...] * inv_hw                                 # (1, C)

        def bottleneck(v):
            h = jnp.dot(v, w1_ref[...],
                        preferred_element_type=jnp.float32) + b1_ref[...]
            h = jnp.maximum(h, 0.0)
            return jnp.dot(h, w2_ref[...],
                           preferred_element_type=jnp.float32) + b2_ref[...]

        s = bottleneck(avg) + bottleneck(max_s[...])              # (1, C)
        sig_ref[0] = pl.reciprocal(1.0 + jnp.exp(-s), approx=True)


def channel_attention(out_b, w1, b1, w2, b2, *, thw_target=512):
    B, HW, C = out_b.shape
    mid = w1.shape[1]
    thw = _pick_tile(HW, thw_target, 8)
    kernel = functools.partial(channel_att_kernel, inv_hw=1.0 / HW)
    return pl.pallas_call(
        kernel,
        out_shape=jax.ShapeDtypeStruct((B, 1, C), jnp.float32),
        grid_spec=pltpu.PrefetchScalarGridSpec(
            num_scalar_prefetch=0,
            grid=(B, HW // thw),
            in_specs=[
                pl.BlockSpec((1, thw, C), lambda b, i: (b, i, 0)),
                pl.BlockSpec((C, mid), lambda b, i: (0, 0)),
                pl.BlockSpec((1, mid), lambda b, i: (0, 0)),
                pl.BlockSpec((mid, C), lambda b, i: (0, 0)),
                pl.BlockSpec((1, C), lambda b, i: (0, 0)),
            ],
            out_specs=pl.BlockSpec((1, 1, C), lambda b, i: (b, 0, 0)),
            scratch_shapes=[pltpu.VMEM((1, C), jnp.float32),
                            pltpu.VMEM((1, C), jnp.float32)],
        ),
        compiler_params=pltpu.CompilerParams(
            dimension_semantics=("parallel", "arbitrary")),
    )(out_b, w1, b1, w2, b2)


# ---------------------------------------------------------------------------
# Kernel 3: per-pixel [max, mean] over channels of fp = sig * out  (fp stays in VMEM)
# ---------------------------------------------------------------------------
def fp_chan_pool_kernel(x_ref, sig_ref, pool_ref):
    x = x_ref[0]                                                  # (thw, C)
    sig = sig_ref[0]                                              # (1, C)
    fp = x * sig
    mx = jnp.max(fp, axis=1, keepdims=True)                       # (thw, 1)
    avg = jnp.sum(fp, axis=1, keepdims=True) * (1.0 / fp.shape[1])
    pool_ref[0] = jnp.concatenate([mx, avg], axis=1)              # order: [max, avg]


def fp_chan_pool(out_b, sig3, *, thw_target=512):
    B, HW, C = out_b.shape
    thw = _pick_tile(HW, thw_target, 8)
    return pl.pallas_call(
        fp_chan_pool_kernel,
        out_shape=jax.ShapeDtypeStruct((B, HW, 2), jnp.float32),
        grid_spec=pltpu.PrefetchScalarGridSpec(
            num_scalar_prefetch=0,
            grid=(B, HW // thw),
            in_specs=[
                pl.BlockSpec((1, thw, C), lambda b, i: (b, i, 0)),
                pl.BlockSpec((1, 1, C), lambda b, i: (b, 0, 0)),
            ],
            out_specs=pl.BlockSpec((1, thw, 2), lambda b, i: (b, i, 0)),
        ),
        compiler_params=pltpu.CompilerParams(
            dimension_semantics=("parallel", "parallel")),
    )(out_b, sig3)


# ---------------------------------------------------------------------------
# Kernel 4: SpatialAttention conv (2->1, 3x3) + sigmoid + final  out + att * (sig*out)
# ---------------------------------------------------------------------------
def spatial_att_combine_kernel(x_ref, sig_ref, p_ref, w_ref, b_ref, o_ref):
    x = x_ref[0]                                                  # (thw, C)
    sig = sig_ref[0]                                              # (1, C)
    fp = x * sig
    p = p_ref[0]                                                  # (thw, 18)
    y = jnp.sum(p * w_ref[...], axis=1, keepdims=True) + b_ref[...]   # (thw, 1)
    att = pl.reciprocal(1.0 + jnp.exp(-y), approx=True)
    o_ref[0] = x + att * fp


def spatial_att_combine(out_b, sig3, sp_patches, sa_w, sa_b, *, thw_target=512):
    B, HW, C = out_b.shape
    K = sp_patches.shape[-1]
    thw = _pick_tile(HW, thw_target, 8)
    return pl.pallas_call(
        spatial_att_combine_kernel,
        out_shape=jax.ShapeDtypeStruct((B, HW, C), jnp.float32),
        grid_spec=pltpu.PrefetchScalarGridSpec(
            num_scalar_prefetch=0,
            grid=(B, HW // thw),
            in_specs=[
                pl.BlockSpec((1, thw, C), lambda b, i: (b, i, 0)),
                pl.BlockSpec((1, 1, C), lambda b, i: (b, 0, 0)),
                pl.BlockSpec((1, thw, K), lambda b, i: (b, i, 0)),
                pl.BlockSpec((1, K), lambda b, i: (0, 0)),
                pl.BlockSpec((1, 1), lambda b, i: (0, 0)),
            ],
            out_specs=pl.BlockSpec((1, thw, C), lambda b, i: (b, i, 0)),
        ),
        compiler_params=pltpu.CompilerParams(
            dimension_semantics=("parallel", "parallel")),
    )(out_b, sig3, sp_patches, sa_w, sa_b)


# ---------------------------------------------------------------------------
# Glue (plain JAX): im2col, parameter setup, forward orchestration
# ---------------------------------------------------------------------------
def im2col_3x3(x_nhwc):
    B, H, W, C = x_nhwc.shape
    xp = jnp.pad(x_nhwc, ((0, 0), (1, 1), (1, 1), (0, 0)))
    cols = [xp[:, ky:ky + H, kx:kx + W, :] for ky in range(3) for kx in range(3)]
    return jnp.concatenate(cols, axis=-1).reshape(B * H * W, 9 * C)


def init_params(key, cin=256 * 3, cout=256, reduction_ratio=1, kernel_cbam=3):
    ks = jax.random.split(key, 11)
    mid = int(cout / float(reduction_ratio))
    return dict(
        conv1_w=0.02 * jax.random.normal(ks[0], (cout, cin, 3, 3), jnp.float32),
        bn_gamma=1.0 + 0.1 * jax.random.normal(ks[1], (cout,), jnp.float32),
        bn_beta=0.1 * jax.random.normal(ks[2], (cout,), jnp.float32),
        bn_mean=0.1 * jax.random.normal(ks[3], (cout,), jnp.float32),
        bn_var=jnp.abs(jax.random.normal(ks[4], (cout,), jnp.float32)) + 0.5,
        ca_w1=0.05 * jax.random.normal(ks[5], (cout, mid), jnp.float32),   # (in, out)
        ca_b1=0.05 * jax.random.normal(ks[6], (mid,), jnp.float32),
        ca_w2=0.05 * jax.random.normal(ks[7], (mid, cout), jnp.float32),
        ca_b2=0.05 * jax.random.normal(ks[8], (cout,), jnp.float32),
        sa_w=0.1 * jax.random.normal(ks[9], (1, 2, kernel_cbam, kernel_cbam), jnp.float32),
        sa_b=0.1 * jax.random.normal(ks[10], (1,), jnp.float32),
    )


def resnet_forward(x_nchw, p):
    B, Cin, H, W = x_nchw.shape
    Cout = p['conv1_w'].shape[0]
    HW = H * W
    x_nhwc = jnp.transpose(x_nchw, (0, 2, 3, 1))

    # conv1 + BN (folded into weights/bias) + ReLU — bf16 matmul, f32 accumulation.
    patches = im2col_3x3(x_nhwc).astype(jnp.bfloat16)                      # (B*HW, 9*Cin)
    eps = 1e-5
    scale = p['bn_gamma'] / jnp.sqrt(p['bn_var'] + eps)                    # (Cout,)
    bias = (p['bn_beta'] - p['bn_mean'] * scale).reshape(1, Cout)
    wmat = (jnp.transpose(p['conv1_w'], (2, 3, 1, 0)).reshape(9 * Cin, Cout)
            * scale[None, :]).astype(jnp.bfloat16)
    out_flat = conv_bn_relu(patches, wmat, bias)                           # (B*HW, Cout) f32
    out_b = out_flat.reshape(B, HW, Cout)

    # CBAM: channel attention (global pool + MLP + sigmoid), weights held in VMEM.
    sig3 = channel_attention(out_b, p['ca_w1'], p['ca_b1'].reshape(1, -1),
                             p['ca_w2'], p['ca_b2'].reshape(1, -1))        # (B, 1, Cout)

    # Per-pixel channel max/mean of fp = sig*out (fp never written to HBM).
    pooled = fp_chan_pool(out_b, sig3)                                     # (B, HW, 2)

    # Spatial attention conv on the tiny 2-ch map (im2col in JAX), fused with combine.
    sp_patches = im2col_3x3(pooled.reshape(B, H, W, 2)).reshape(B, HW, 18)
    sa_wrow = jnp.transpose(p['sa_w'], (2, 3, 1, 0)).reshape(1, 18)
    out_final = spatial_att_combine(out_b, sig3, sp_patches,
                                    sa_wrow, p['sa_b'].reshape(1, 1))      # (B, HW, Cout)

    # F.avg_pool2d(out, 1) is the identity.
    return jnp.transpose(out_final.reshape(B, H, W, Cout), (0, 3, 1, 2))   # NCHW


def resnet_forward_reference(x_nchw, p):
    """Pure-JAX reference with identical math (conv matmul also in bf16)."""
    B, Cin, H, W = x_nchw.shape
    Cout = p['conv1_w'].shape[0]
    x_nhwc = jnp.transpose(x_nchw, (0, 2, 3, 1))
    patches = im2col_3x3(x_nhwc)
    eps = 1e-5
    scale = p['bn_gamma'] / jnp.sqrt(p['bn_var'] + eps)
    bias = p['bn_beta'] - p['bn_mean'] * scale
    wmat = jnp.transpose(p['conv1_w'], (2, 3, 1, 0)).reshape(9 * Cin, Cout) * scale[None, :]
    out = jnp.maximum(
        jnp.dot(patches.astype(jnp.bfloat16), wmat.astype(jnp.bfloat16),
                preferred_element_type=jnp.float32) + bias, 0.0)
    out_b = out.reshape(B, H * W, Cout)
    avg, mx = out_b.mean(axis=1), out_b.max(axis=1)

    def bottleneck(v):
        return jnp.maximum(v @ p['ca_w1'] + p['ca_b1'], 0.0) @ p['ca_w2'] + p['ca_b2']

    sig = jax.nn.sigmoid(bottleneck(avg) + bottleneck(mx))
    fp = out_b * sig[:, None, :]
    pooled = jnp.concatenate([fp.max(axis=2, keepdims=True),
                              fp.mean(axis=2, keepdims=True)], axis=2).reshape(B, H, W, 2)
    sp_patches = im2col_3x3(pooled)
    sa_wmat = jnp.transpose(p['sa_w'], (2, 3, 1, 0)).reshape(18, 1)
    att = jax.nn.sigmoid(sp_patches @ sa_wmat + p['sa_b'])
    out_final = out + att * fp.reshape(B * H * W, Cout)
    return jnp.transpose(out_final.reshape(B, H, W, Cout), (0, 3, 1, 2))


if __name__ == "__main__":
    key = jax.random.PRNGKey(0)
    kx, kp = jax.random.split(key)
    B, Cin, H, W = 2, 256 * 3, 8, 8          # conv1 is hard-wired to 768 -> 256 channels
    x = jax.random.normal(kx, (B, Cin, H, W), jnp.float32)
    params = init_params(kp)

    out = jax.block_until_ready(resnet_forward(x, params))
    assert out.shape == (B, 256, H, W)

    ref = resnet_forward_reference(x, params)
    assert jnp.allclose(out, ref, atol=3e-2, rtol=3e-2), float(jnp.max(jnp.abs(out - ref)))
    print("KERNEL_OK")
</pallas_src>

<mosaic_0001>
module attributes {stable_mosaic.version = 11 : i64} {
  func.func @conv_bn_relu_kernel(%arg0: i32, %arg1: i32, %arg2: memref<128x768xbf16, #tpu.memory_space<vmem>>, %arg3: memref<768x256xbf16, #tpu.memory_space<vmem>>, %arg4: memref<1x256xf32, #tpu.memory_space<vmem>>, %arg5: memref<128x256xf32, #tpu.memory_space<vmem>>) attributes {dimension_semantics = [#tpu.dimension_semantics<parallel>, #tpu.dimension_semantics<arbitrary>], iteration_bounds = array<i64: 1, 9>, scalar_prefetch = 0 : i64, scratch_operands = 0 : i64, tpu.core_type = #tpu.core_type<tc>, window_params = [{transform_indices = @transform_0, window_bounds = array<i64: 128, 768>}, {transform_indices = @transform_1, window_bounds = array<i64: 768, 256>}, {pipeline_mode = #tpu.pipeline_mode<synchronous>, transform_indices = @transform_2, window_bounds = array<i64: 1, 256>}, {transform_indices = @transform_3, window_bounds = array<i64: 128, 256>}]} {
    %c0_i32 = arith.constant 0 : i32
    %0 = arith.cmpi eq, %arg1, %c0_i32 : i32
    %1 = arith.extui %0 : i1 to i32
    %c0_i32_0 = arith.constant 0 : i32
    %2 = arith.cmpi ne, %1, %c0_i32_0 : i32
    scf.if %2 {
      %cst_9 = arith.constant 0.000000e+00 : f32
      %12 = vector.broadcast %cst_9 : f32 to vector<128x256xf32>
      %c0_10 = arith.constant 0 : index
      %c0_11 = arith.constant 0 : index
      %13 = vector.load %arg5[%c0_10, %c0_11] : memref<128x256xf32, #tpu.memory_space<vmem>>, vector<128x256xf32>
      tpu.vector_store %arg5[%c0_10, %c0_11], %12 {strides = array<i32>} : memref<128x256xf32, #tpu.memory_space<vmem>>, vector<128x256xf32>,
    } else {
    }
    %c0 = arith.constant 0 : index
    %c0_1 = arith.constant 0 : index
    %3 = vector.load %arg5[%c0, %c0_1] : memref<128x256xf32, #tpu.memory_space<vmem>>, vector<128x256xf32>
    %c0_2 = arith.constant 0 : index
    %c0_3 = arith.constant 0 : index
    %4 = vector.load %arg2[%c0_2, %c0_3] : memref<128x768xbf16, #tpu.memory_space<vmem>>, vector<128x768xbf16>
    %c0_4 = arith.constant 0 : index
    %c0_5 = arith.constant 0 : index
    %5 = vector.load %arg3[%c0_4, %c0_5] : memref<768x256xbf16, #tpu.memory_space<vmem>>, vector<768x256xbf16>
    %cst = arith.constant dense<0.000000e+00> : vector<128x256xf32>
    %6 = tpu.matmul %4, %5, %cst {dimension_numbers = #tpu.dot_dimension_numbers<[1], [0], [0], [1], [0, 0, 1, 1], [], []>} : vector<128x768xbf16>, vector<768x256xbf16>, vector<128x256xf32> -> vector<128x256xf32>
    %7 = arith.addf %3, %6 : vector<128x256xf32>
    %c0_6 = arith.constant 0 : index
    %c0_7 = arith.constant 0 : index
    %8 = vector.load %arg5[%c0_6, %c0_7] : memref<128x256xf32, #tpu.memory_space<vmem>>, vector<128x256xf32>
    tpu.vector_store %arg5[%c0_6, %c0_7], %7 {strides = array<i32>} : memref<128x256xf32, #tpu.memory_space<vmem>>, vector<128x256xf32>,
    %c8_i32 = arith.constant 8 : i32
    %9 = arith.cmpi eq, %arg1, %c8_i32 : i32
    %10 = arith.extui %9 : i1 to i32
    %c0_i32_8 = arith.constant 0 : i32
    %11 = arith.cmpi ne, %10, %c0_i32_8 : i32
    scf.if %11 {
      %c0_9 = arith.constant 0 : index
      %c0_10 = arith.constant 0 : index
      %12 = vector.load %arg5[%c0_9, %c0_10] : memref<128x256xf32, #tpu.memory_space<vmem>>, vector<128x256xf32>
      %c0_11 = arith.constant 0 : index
      %c0_12 = arith.constant 0 : index
      %13 = vector.load %arg4[%c0_11, %c0_12] : memref<1x256xf32, #tpu.memory_space<vmem>>, vector<1x256xf32>
      %14 = vector.broadcast %13 : vector<1x256xf32> to vector<128x256xf32>
      %15 = arith.addf %12, %14 : vector<128x256xf32>
      %cst_13 = arith.constant 0.000000e+00 : f32
      %16 = vector.broadcast %cst_13 : f32 to vector<128x256xf32>
      %17 = arith.maximumf %15, %16 : vector<128x256xf32>
      %c0_14 = arith.constant 0 : index
      %c0_15 = arith.constant 0 : index
      %18 = vector.load %arg5[%c0_14, %c0_15] : memref<128x256xf32, #tpu.memory_space<vmem>>, vector<128x256xf32>
      tpu.vector_store %arg5[%c0_14, %c0_15], %17 {strides = array<i32>} : memref<128x256xf32, #tpu.memory_space<vmem>>, vector<128x256xf32>,
    } else {
    }
    return
  }
  func.func @transform_0(%arg0: i32, %arg1: i32) -> (i32, i32) {
    %c0_i32 = arith.constant 0 : i32
    return %arg0, %arg1 : i32, i32
  }
  func.func @transform_1(%arg0: i32, %arg1: i32) -> (i32, i32) {
    %c0_i32 = arith.constant 0 : i32
    %c0_i32_0 = arith.constant 0 : i32
    return %arg1, %c0_i32 : i32, i32
  }
  func.func @transform_2(%arg0: i32, %arg1: i32) -> (i32, i32) {
    %c0_i32 = arith.constant 0 : i32
    %c0_i32_0 = arith.constant 0 : i32
    %c0_i32_1 = arith.constant 0 : i32
    return %c0_i32, %c0_i32_0 : i32, i32
  }
  func.func @transform_3(%arg0: i32, %arg1: i32) -> (i32, i32) {
    %c0_i32 = arith.constant 0 : i32
    %c0_i32_0 = arith.constant 0 : i32
    return %arg0, %c0_i32 : i32, i32
  }
}

</mosaic_0001>

<bundles_post_ra>
// kernel: tpu_custom_call.1
= control target key start
LH: loop header
LB: loop body
LE: loop exit
PB: predicated region body
PF: predicated region fallthrough
CT: control target
= control target key end

     0   :  { %s3115_s0 = inlined_call_operand.hbm [shape: bf16[128,6912], index: 0, kind: input, shape index: {}]   ;;  %s3116_s1 = inlined_call_operand.hbm [shape: bf16[6912,256], index: 1, kind: input, shape index: {}]   ;;  %s3117_s2 = inlined_call_operand.hbm [shape: f32[1,256], index: 2, kind: input, shape index: {}]   ;;  %s3118_s3 = inlined_call_operand.hbm [shape: f32[128,256], index: 3, kind: output, shape index: {}]  }
   0x1   :  { %3123 = sst [smem:[#allocation13_spill]] %s3115_s0 }
   0x2   :  { %8 = vsyncpa [#allocation3], 0 }
   0x3   :  { %10 = vsyncpa [#allocation3 + $0x1], 0 }
   0x4   :  { %11 = vsyncpa [#allocation6], 0 }
   0x5   :  { %13 = vsyncpa [#allocation6 + $0x1], 0 }
   0x6   :  { %14 = vsyncpa [#allocation4], 0  ;;  %s2619_s12 = smov 0   ;;  %s2621_s13 = smov 0  }
   0x7   :  { %s2623_s14 = smov 0   ;;  %s2625_s15 = smov 0  }
   0x8   :  { %s2627_s16 = smov 0   ;;  %s2629_s17 = smov 0  }
   0x9 LB: > { %s2648_s18 = sadd.s32 4294967295, %s2585_s17   ;;  %s41_s19 = sadd.s32 1, %s2573_s14  ;;  %s2585_s17 = sphi %s2629_s17, %s20_s17   ;;  %s2581_s16 = sphi %s2627_s16, %s3138_s16   ;;  %s2577_s15 = sphi %s2625_s15, %s3137_s15   ;;  %s2573_s14 = sphi %s2623_s14, %s3136_s14   ;;  %s2569_s13 = sphi %s2621_s13, %s3135_s13   ;;  %s2565_s12 = sphi %s2619_s12, %s3134_s12  }
   0xa   : > { %p48_p0 = scmp.ne.s32.totalorder %s2573_s14, %s2569_s13  ;;  %p49_p1 = scmp.eq.s32.totalorder %s2585_s17, 0 }
   0xb   : > { %p54_p2 = scmp.ne.s32.totalorder %s2569_s13, %s2565_s12  ;;  %p3119_p3 = scmp.eq.s32.totalorder %s2648_s18, 0 }
   0xc   : > { %p50_p4 = por %p49_p1, %p48_p0  ;;  %p1845_p5 = scmp.ge.s32.totalorder %s2585_s17, 1 }
   0xd   : > { %p2659_p6 = por %p3119_p3, %p54_p2  ;;  %p138_p7 = scmp.lt.s32.totalorder %s2585_s17, 10 }
   0xe   : > { %s2587_s22 = smov [#allocation7]   ;;  %p2131_p10 = scmp.lt.s32.totalorder %s2585_s17, 9 }
   0xf   : > { %s3124_s20 = scalar_select %p2659_p6, 1, 0 }
  0x10   : > { %p2664_p8 = pnand %p1845_p5, %p138_p7  ;;  %s151_s23 = sshll.u32 %s2587_s22, 4  ;;  %s152_s23 = int_to_ptr.vmem [resolvable:$true] %s151_s23 }
  0x11   : > { %s2672_s24 = sand.u32 1, %s2573_s14   ;;  %p2680_p12 = pnand %p2131_p10, %p50_p4 }
  0x12   : > { %s3125_s21 = scalar_select %p2664_p8, 1, 0 }
  0x13   : > { %p2119_p9 = pneg %p2664_p8  ;;  %s2409_s29 = scalar_lea.hbm %s3117_s2, 32 }
  0x14   : > { %s3127_s26 = scalar_select %p2680_p12, 1, 0 }
  0x15   : > { %p2676_p11 = pnand %p2119_p9, %p3119_p3  ;;  %p2410_p13 = scmp.ne.s32.totalorder %s3117_s2, %s2409_s29 }
  0x16   : > { %p2416_p5 = scmp.lt.u32.totalorder %s2409_s29, %s3117_s2 }
  0x17   : > { %p2411_p0 = pneg %p2676_p11 }
  0x19   : > { %p2412_p1 = pnand %p2411_p0, %p2410_p13 }
  0x1b   : > { %p2413_p2 = pneg %p2412_p1 }
  0x1d   : > { %p2418_p4 = pnand %p2416_p5, %p2413_p2 }
  0x1f   : > { %2421 = shalt.err (!%p2418_p4)
}
  0x20   : > { %s2422_s7 = scalar_lea.vmem %s152_s23, 32  ;;  %p2430_p3 = scmp.lt.s32.totalorder %s152_s23, %s152_s23 }
  0x21   : > { %p2423_p7 = scmp.ne.s32.totalorder %s152_s23, %s2422_s7  ;;  %p2431_p6 = scmp.lt.s32.totalorder %s2422_s7, %s2422_s7 }
  0x23   : > { %p2425_p9 = pnand %p2423_p7, %p2411_p0  ;;  %p2432_p8 = por %p2431_p6, %p2430_p3 }
  0x25   : > { %p2426_p10 = pneg %p2425_p9 }
  0x27   : > { %p2433_p12 = pnand %p2432_p8, %p2426_p10 }
  0x29   : > { %2436 = shalt.err (!%p2433_p12)
}
  0x2a   : > { %2122 = dma.hbm_to_vmem [thread:$0]  (!%p2676_p11), %s3117_s2, 32, %s152_s23, [#allocation6]  }
  0x2b   : > { %s29_s10 = sadd.s32 1, %s2581_s16  ;;  %s2103_s11 = smul.u32 384, %s2672_s24 }
  0x2c   : > { %p30_p3 = scmp.ge.s32.totalorder %s29_s10, 9  ;;  %s2003_s12 = smul.u32 384, %s2581_s16 }
  0x2d   : > { %s3128_s0 = sld [smem:[#allocation13_spill]]  ;;  %s166_s28 = scalar_lea.vmem [#allocation2], %s2103_s11 }
  0x2e   : > { %s3140_s10 = smov (%p30_p3, %s29_s10), 0  ;;  %s176_s29 = sshll.u32 %s166_s28, 4  ;;  %s2712_s29 = int_to_ptr.vmem [resolvable:$true] %s176_s29 }
  0x2f   : > { %s37_s23 = ssub.s32 %s2581_s16, %s3140_s10  ;;  %s186_s30 = sand.u32 1, %s2585_s17  }
  0x30   : > { %p39_p6 = scmp.eq.s32.totalorder %s37_s23, 0  ;;  %s163_s5 = scalar_lea.sflag [#allocation3], %s2672_s24 }
  0x31   : > { %p3129_p11 = scmp.ne.s32.totalorder %s3127_s26, 0 }
  0x32   : > { %s2718_s4 = scalar_select %p39_p6, %s2573_s14, %s41_s19  }
  0x33   : > { %s2708_s27 = scalar_lea.hbm %s3128_s0, %s2003_s12  ;;  %p2439_p12 = pneg %p3129_p11 }
  0x34   : > { %s2437_s6 = scalar_lea.hbm %s2708_s27, 6144  ;;  %s2442_s9 = scalar_lea.hbm %s3128_s0, 55296 }
  0x35   : > { %p2438_p8 = scmp.ne.s32.totalorder %s2708_s27, %s2437_s6  ;;  %p2443_p1 = scmp.lt.u32.totalorder %s2708_s27, %s3128_s0 }
  0x36   : > { %p2444_p2 = scmp.lt.u32.totalorder %s2442_s9, %s2437_s6  ;;  %p2446_p4 = scmp.lt.u32.totalorder %s2437_s6, %s2708_s27 }
  0x37   : > { %p2440_p13 = pnand %p2439_p12, %p2438_p8 }
  0x38   : > { %p2445_p5 = por %p2444_p2, %p2443_p1 }
  0x39   : > { %p2441_p0 = pneg %p2440_p13 }
  0x3a   : > { %p2447_p7 = por %p2446_p4, %p2445_p5 }
  0x3c   : > { %p2448_p9 = pnand %p2447_p7, %p2441_p0 }
  0x3e   : > { %2451 = shalt.err (!%p2448_p9)
}
  0x3f   : > { %s2452_s19 = scalar_lea.vmem %s2712_s29, 6144  ;;  %s2588_s22 = smov [#allocation2]  }
  0x40   : > { %p2453_p10 = scmp.ne.s32.totalorder %s2712_s29, %s2452_s19  ;;  %s2457_s25 = sshll.u32 %s2588_s22, 4  ;;  %s2458_s25 = int_to_ptr.vmem [resolvable:$false] %s2457_s25 }
  0x41   : > { %s2459_s28 = scalar_lea.vmem %s2458_s25, 12288  ;;  %p2460_p8 = scmp.lt.s32.totalorder %s2712_s29, %s2458_s25 }
  0x42   : > { %p2455_p3 = pnand %p2453_p10, %p2439_p12  ;;  %p2461_p13 = scmp.lt.s32.totalorder %s2459_s28, %s2452_s19 }
  0x44   : > { %p2456_p6 = pneg %p2455_p3  ;;  %p2462_p1 = por %p2461_p13, %p2460_p8 }
  0x46   : > { %p2463_p2 = pnand %p2462_p1, %p2456_p6 }
  0x48   : > { %2466 = shalt.err (!%p2463_p2)
}
  0x49   : > { %s2589_s23 = smov 3456   ;;  %s2590_s6 = smov 384  }
  0x4a   : > { %s2591_s7 = smov 24   ;;  %s2104_s8 = smul.u32 768, %s2672_s24 }
  0x4b   : > { %2126 = dma.hbm_to_vmem [thread:$0]  (!%p3129_p11), %s2708_s27, 6144, %s2712_s29, %s163_s5, %s2589_s23, %s2590_s6, %s2591_s7  }
  0x4c   : > { %s2006_s9 = smul.u32 12288, %s2581_s16  ;;  %s190_s22 = scalar_lea.vmem [#allocation5], %s2104_s8 }
  0x4d   : > { %s198_s25 = sshll.u32 %s190_s22, 4  ;;  %s2759_s28 = scalar_lea.sflag [#allocation6], %s186_s30  ;;  %s2755_s25 = int_to_ptr.vmem [resolvable:$true] %s198_s25 }
  0x4e   : > { %s2753_s19 = scalar_lea.hbm %s3116_s1, %s2006_s9  ;;  %s2472_s29 = scalar_lea.hbm %s3116_s1, 110592 }
  0x4f   : > { %s2467_s0 = scalar_lea.hbm %s2753_s19, 12288  ;;  %p2473_p7 = scmp.lt.u32.totalorder %s2753_s19, %s3116_s1 }
  0x50   : > { %p2468_p0 = scmp.ne.s32.totalorder %s2753_s19, %s2467_s0  ;;  %p2474_p9 = scmp.lt.u32.totalorder %s2472_s29, %s2467_s0 }
  0x51   : > { %p2476_p3 = scmp.lt.u32.totalorder %s2467_s0, %s2753_s19 }
  0x52   : > { %p2470_p5 = pnand %p2468_p0, %p2439_p12  ;;  %p2475_p10 = por %p2474_p9, %p2473_p7 }
  0x54   : > { %p2471_p4 = pneg %p2470_p5  ;;  %p2477_p6 = por %p2476_p3, %p2475_p10 }
  0x56   : > { %p2478_p8 = pnand %p2477_p6, %p2471_p4 }
  0x58   : > { %2481 = shalt.err (!%p2478_p8)
}
  0x59   : > { %s2482_s30 = scalar_lea.vmem %s2755_s25, 12288  ;;  %s2592_s6 = smov [#allocation5]  }
  0x5a   : > { %p2483_p13 = scmp.ne.s32.totalorder %s2755_s25, %s2482_s30  ;;  %s2487_s7 = sshll.u32 %s2592_s6, 4  ;;  %s2488_s7 = int_to_ptr.vmem [resolvable:$false] %s2487_s7 }
  0x5b   : > { %s2489_s8 = scalar_lea.vmem %s2488_s7, 24576  ;;  %p2490_p0 = scmp.lt.s32.totalorder %s2755_s25, %s2488_s7 }
  0x5c   : > { %p2485_p1 = pnand %p2483_p13, %p2439_p12  ;;  %p2491_p5 = scmp.lt.s32.totalorder %s2489_s8, %s2482_s30 }
  0x5e   : > { %p2486_p2 = pneg %p2485_p1  ;;  %p2492_p7 = por %p2491_p5, %p2490_p0 }
  0x60   : > { %p2493_p9 = pnand %p2492_p7, %p2486_p2 }
  0x62   : > { %2496 = shalt.err (!%p2493_p9)
}
  0x63   : > { %s2593_s0 = smov 128   ;;  %s2594_s9 = smov 8  }
  0x64   : > { %2129 = dma.hbm_to_vmem [thread:$0]  (!%p3129_p11), %s2753_s19, 12288, %s2755_s25, %s2759_s28, %s2593_s0, %s2593_s0, %s2594_s9  }
  0x65   : > { %p3130_p12 = scmp.ne.s32.totalorder %s3125_s21, 0 }
  0x66   : > { %s212_s11 = sand.u32 (!%p3130_p12), 1, %s2569_s13   ;;  %p3131_p4 = scmp.ne.s32.totalorder (!%p3130_p12), %s3124_s20, 0 }
  0x67   : > { %210 = sbr.rel (%p3130_p12) target bundleno = 558 (0x22e), region = 32  ;;  %s213_s22 = scalar_lea.sflag (!%p3130_p12), [#allocation3], %s212_s11 }
  0x68   : > { %s2105_s12 = smul.u32 (!%p3130_p12), 384, %s212_s11 }
  0x6a   : > { %s2788_s24 = scalar_lea.vmem (!%p3130_p12), [#allocation2], %s2105_s12 }
  0x6e   : > { %2548 = dma.done.wait (%p3131_p4), %s213_s22, 6144  }
  0x6f   : > { %2550 = vsyncadd (%p3131_p4), %s213_s22, 4294961152  ;;  %s221_s27 = sand.u32 1, %s2648_s18   ;;  %s2106_s26 = smul.u32 768, %s212_s11 }
  0x70   : > { %s222_s19 = scalar_lea.sflag [#allocation6], %s221_s27 }
  0x71   : > { %s2795_s25 = scalar_lea.vmem [#allocation5], %s2106_s26 }
  0x72   : > { %2552 = dma.done.wait (%p3131_p4), %s222_s19, 12288  }
  0x73   : > { %2554 = vsyncadd (%p3131_p4), %s222_s19, 4294955008  ;;  %p3132_p11 = scmp.eq.s32.totalorder %s2648_s18, 0 }
  0x75   : > { %2556 = dma.done.wait (%p3132_p11), [#allocation6], 32   ;;  %p3133_p10 = pmov %p3132_p11 }
  0x76   : > { %p1853_p3 = scmp.ne.s32.totalorder %s2577_s15, 0 }
  0x77   : > { %2558 = vsyncadd (%p3133_p10), [#allocation6], 4294967264  ;;  %v2595_v0 = vmov (!%p1853_p3), 0.0  }
  0x78   : > { %259 = sbr.rel (%p1853_p3) target bundleno = 136 (0x88), region = 48  ;;  %260 = vst [vmem:[#allocation8] sm:$0xff] (!%p1853_p3), %v2595_v0  ;;  %261 = vst [vmem:[#allocation8 + $0x8] sm:$0xff] (!%p1853_p3), %v2595_v0 }
  0x79   : > { %262 = vst [vmem:[#allocation8 + $0x10] sm:$0xff] (!%p1853_p3), %v2595_v0  ;;  %263 = vst [vmem:[#allocation8 + $0x18] sm:$0xff] (!%p1853_p3), %v2595_v0 }
  0x7a   : > { %264 = vst [vmem:[#allocation8 + $0x20] sm:$0xff] (!%p1853_p3), %v2595_v0  ;;  %265 = vst [vmem:[#allocation8 + $0x28] sm:$0xff] (!%p1853_p3), %v2595_v0 }
  0x7b   : > { %266 = vst [vmem:[#allocation8 + $0x30] sm:$0xff] (!%p1853_p3), %v2595_v0  ;;  %267 = vst [vmem:[#allocation8 + $0x38] sm:$0xff] (!%p1853_p3), %v2595_v0 }
  0x7c   : > { %268 = vst [vmem:[#allocation8 + $0x40] sm:$0xff] (!%p1853_p3), %v2595_v0  ;;  %269 = vst [vmem:[#allocation8 + $0x48] sm:$0xff] (!%p1853_p3), %v2595_v0 }
  0x7d   : > { %270 = vst [vmem:[#allocation8 + $0x50] sm:$0xff] (!%p1853_p3), %v2595_v0  ;;  %271 = vst [vmem:[#allocation8 + $0x58] sm:$0xff] (!%p1853_p3), %v2595_v0 }
  0x7e   : > { %272 = vst [vmem:[#allocation8 + $0x60] sm:$0xff] (!%p1853_p3), %v2595_v0  ;;  %273 = vst [vmem:[#allocation8 + $0x68] sm:$0xff] (!%p1853_p3), %v2595_v0 }
  0x7f   : > { %274 = vst [vmem:[#allocation8 + $0x70] sm:$0xff] %v2595_v0  ;;  %275 = vst [vmem:[#allocation8 + $0x78] sm:$0xff] %v2595_v0 }
  0x80   : > { %276 = vst [vmem:[#allocation8 + $0x80] sm:$0xff] %v2595_v0  ;;  %277 = vst [vmem:[#allocation8 + $0x88] sm:$0xff] %v2595_v0 }
  0x81   : > { %278 = vst [vmem:[#allocation8 + $0x90] sm:$0xff] %v2595_v0  ;;  %279 = vst [vmem:[#allocation8 + $0x98] sm:$0xff] %v2595_v0 }
  0x82   : > { %280 = vst [vmem:[#allocation8 + $0xa0] sm:$0xff] %v2595_v0  ;;  %281 = vst [vmem:[#allocation8 + $0xa8] sm:$0xff] %v2595_v0 }
  0x83   : > { %282 = vst [vmem:[#allocation8 + $0xb0] sm:$0xff] %v2595_v0  ;;  %283 = vst [vmem:[#allocation8 + $0xb8] sm:$0xff] %v2595_v0 }
  0x84   : > { %284 = vst [vmem:[#allocation8 + $0xc0] sm:$0xff] %v2595_v0  ;;  %285 = vst [vmem:[#allocation8 + $0xc8] sm:$0xff] %v2595_v0 }
  0x85   : > { %286 = vst [vmem:[#allocation8 + $0xd0] sm:$0xff] %v2595_v0  ;;  %287 = vst [vmem:[#allocation8 + $0xd8] sm:$0xff] %v2595_v0 }
  0x86   : > { %288 = vst [vmem:[#allocation8 + $0xe0] sm:$0xff] %v2595_v0  ;;  %289 = vst [vmem:[#allocation8 + $0xe8] sm:$0xff] %v2595_v0 }
  0x87   : > { %290 = vst [vmem:[#allocation8 + $0xf0] sm:$0xff] %v2595_v0  ;;  %291 = vst [vmem:[#allocation8 + $0xf8] sm:$0xff] %v2595_v0 }
  0x88 PF: > { %v2193_v1 = vld [vmem:[%s2795_s25 + $0x4] ss:$8 sps:$4 sm:$0xff]   ;;  %v2197_v3 = vld [vmem:[%s2795_s25] ss:$8 sps:$4 sm:$0xff]   ;;  %v2199_v5 = vld [vmem:[%s2795_s25 + $0x14] ss:$8 sps:$4 sm:$0xff]  }
  0x89   : > { %v2195_v2 = vld [vmem:[%s2795_s25 + $0x104] ss:$8 sps:$4 sm:$0xff]   ;;  %1188 = vmatprep.subr.bf16.mxu1 %v2193_v1  ;;  %v2198_v4 = vld [vmem:[%s2795_s25 + $0x100] ss:$8 sps:$4 sm:$0xff]   ;;  %v2201_v6 = vld [vmem:[%s2795_s25 + $0x114] ss:$8 sps:$4 sm:$0xff]  }
  0x8a   : > { %1301 = vmatprep.subr.bf16.mxu0 %v2195_v2  ;;  %1189 = vmatpush1.bf16.msra.mxu1 %v2197_v3  ;;  %v2203_v7 = vld [vmem:[%s2795_s25 + $0x10] ss:$8 sps:$4 sm:$0xff]   ;;  %v2205_v9 = vld [vmem:[%s2795_s25 + $0x24] ss:$8 sps:$4 sm:$0xff]   ;;  %v2209_v11 = vld [vmem:[%s2795_s25 + $0x20] ss:$8 sps:$4 sm:$0xff]  }
  0x8b   : > { %1302 = vmatpush1.bf16.msra.mxu0 %v2198_v4  ;;  %1190 = vmatprep.subr.bf16.mxu1 %v2199_v5  ;;  %v2204_v8 = vld [vmem:[%s2795_s25 + $0x110] ss:$8 sps:$4 sm:$0xff]   ;;  %v2207_v10 = vld [vmem:[%s2795_s25 + $0x124] ss:$8 sps:$4 sm:$0xff]   ;;  %v2210_v12 = vld [vmem:[%s2795_s25 + $0x120] ss:$8 sps:$4 sm:$0xff]  }
  0x8c   : > { %1303 = vmatprep.subr.bf16.mxu0 %v2201_v6  ;;  %v2211_v13 = vld [vmem:[%s2795_s25 + $0x34] ss:$8 sps:$4 sm:$0xff]   ;;  %v2215_v15 = vld [vmem:[%s2795_s25 + $0x30] ss:$8 sps:$4 sm:$0xff]   ;;  %v2217_v17 = vld [vmem:[%s2795_s25 + $0x44] ss:$8 sps:$4 sm:$0xff]  }
  0x8d   : > { %v2213_v14 = vld [vmem:[%s2795_s25 + $0x134] ss:$8 sps:$4 sm:$0xff]   ;;  %v2216_v16 = vld [vmem:[%s2795_s25 + $0x130] ss:$8 sps:$4 sm:$0xff]   ;;  %v2219_v18 = vld [vmem:[%s2795_s25 + $0x144] ss:$8 sps:$4 sm:$0xff]  }
  0x8e   : > { %1191 = vmatpush1.bf16.msra.mxu1 %v2203_v7  ;;  %v2221_v19 = vld [vmem:[%s2795_s25 + $0x40] ss:$8 sps:$4 sm:$0xff]   ;;  %v2223_v21 = vld [vmem:[%s2795_s25 + $0x54] ss:$8 sps:$4 sm:$0xff]   ;;  %v2227_v23 = vld [vmem:[%s2795_s25 + $0x50] ss:$8 sps:$4 sm:$0xff]  }
  0x8f   : > { %1304 = vmatpush1.bf16.msra.mxu0 %v2204_v8  ;;  %1192 = vmatprep.subr.bf16.mxu1 %v2205_v9  ;;  %v2222_v20 = vld [vmem:[%s2795_s25 + $0x140] ss:$8 sps:$4 sm:$0xff]   ;;  %v2225_v22 = vld [vmem:[%s2795_s25 + $0x154] ss:$8 sps:$4 sm:$0xff]   ;;  %v2228_v24 = vld [vmem:[%s2795_s25 + $0x150] ss:$8 sps:$4 sm:$0xff]  }
  0x90   : > { %1305 = vmatprep.subr.bf16.mxu0 %v2207_v10  ;;  %v2229_v25 = vld [vmem:[%s2795_s25 + $0x64] ss:$8 sps:$4 sm:$0xff]   ;;  %v2233_v27 = vld [vmem:[%s2795_s25 + $0x60] ss:$8 sps:$4 sm:$0xff]   ;;  %v2235_v29 = vld [vmem:[%s2795_s25 + $0x74] ss:$8 sps:$4 sm:$0xff]  }
  0x91   : > { %v2231_v26 = vld [vmem:[%s2795_s25 + $0x164] ss:$8 sps:$4 sm:$0xff]   ;;  %v2234_v28 = vld [vmem:[%s2795_s25 + $0x160] ss:$8 sps:$4 sm:$0xff]   ;;  %v2237_v30 = vld [vmem:[%s2795_s25 + $0x174] ss:$8 sps:$4 sm:$0xff]  }
  0x92   : > { %1193 = vmatpush1.bf16.msra.mxu1 %v2209_v11  ;;  %v2239_v31 = vld [vmem:[%s2795_s25 + $0x70] ss:$8 sps:$4 sm:$0xff]   ;;  %v2241_v33 = vld [vmem:[%s2795_s25 + $0x84] ss:$8 sps:$4 sm:$0xff]   ;;  %v2245_v35 = vld [vmem:[%s2795_s25 + $0x80] ss:$8 sps:$4 sm:$0xff]  }
  0x93   : > { %1306 = vmatpush1.bf16.msra.mxu0 %v2210_v12  ;;  %1194 = vmatprep.subr.bf16.mxu1 %v2211_v13  ;;  %v2240_v32 = vld [vmem:[%s2795_s25 + $0x170] ss:$8 sps:$4 sm:$0xff]   ;;  %v2243_v34 = vld [vmem:[%s2795_s25 + $0x184] ss:$8 sps:$4 sm:$0xff]   ;;  %v2246_v36 = vld [vmem:[%s2795_s25 + $0x180] ss:$8 sps:$4 sm:$0xff]  }
  0x94   : > { %1307 = vmatprep.subr.bf16.mxu0 %v2213_v14  ;;  %v2247_v37 = vld [vmem:[%s2795_s25 + $0x94] ss:$8 sps:$4 sm:$0xff]   ;;  %v2251_v39 = vld [vmem:[%s2795_s25 + $0x90] ss:$8 sps:$4 sm:$0xff]   ;;  %v2253_v41 = vld [vmem:[%s2795_s25 + $0xa4] ss:$8 sps:$4 sm:$0xff]  }
  0x95   : > { %v2249_v38 = vld [vmem:[%s2795_s25 + $0x194] ss:$8 sps:$4 sm:$0xff]   ;;  %v2252_v40 = vld [vmem:[%s2795_s25 + $0x190] ss:$8 sps:$4 sm:$0xff]   ;;  %v2255_v42 = vld [vmem:[%s2795_s25 + $0x1a4] ss:$8 sps:$4 sm:$0xff]  }
  0x96   : > { %1195 = vmatpush1.bf16.msra.mxu1 %v2215_v15  ;;  %v2257_v43 = vld [vmem:[%s2795_s25 + $0xa0] ss:$8 sps:$4 sm:$0xff]   ;;  %v2259_v45 = vld [vmem:[%s2795_s25 + $0xb4] ss:$8 sps:$4 sm:$0xff]   ;;  %v2263_v47 = vld [vmem:[%s2795_s25 + $0xb0] ss:$8 sps:$4 sm:$0xff]  }
  0x97   : > { %1308 = vmatpush1.bf16.msra.mxu0 %v2216_v16  ;;  %1196 = vmatprep.subr.bf16.mxu1 %v2217_v17  ;;  %v2258_v44 = vld [vmem:[%s2795_s25 + $0x1a0] ss:$8 sps:$4 sm:$0xff]   ;;  %v2261_v46 = vld [vmem:[%s2795_s25 + $0x1b4] ss:$8 sps:$4 sm:$0xff]   ;;  %v2264_v48 = vld [vmem:[%s2795_s25 + $0x1b0] ss:$8 sps:$4 sm:$0xff]  }
  0x98   : > { %1309 = vmatprep.subr.bf16.mxu0 %v2219_v18  ;;  %v2265_v49 = vld [vmem:[%s2795_s25 + $0xc4] ss:$8 sps:$4 sm:$0xff]   ;;  %v2269_v53 = vld [vmem:[%s2795_s25 + $0xc0] ss:$8 sps:$4 sm:$0xff]   ;;  %v2271_v55 = vld [vmem:[%s2795_s25 + $0xd4] ss:$8 sps:$4 sm:$0xff]  }
  0x99   : > { %v2291_v50 = vld [vmem:[%s2788_s24 + $0x4] ss:$24 sps:$4 sm:$0xff]   ;;  %v2270_v54 = vld [vmem:[%s2795_s25 + $0x1c0] ss:$8 sps:$4 sm:$0xff]   ;;  %v2275_v57 = vld [vmem:[%s2795_s25 + $0xd0] ss:$8 sps:$4 sm:$0xff]  }
  0x9a   : > { %1197 = vmatpush1.bf16.msra.mxu1 %v2221_v19  ;;  %v2267_v51 = vld [vmem:[%s2795_s25 + $0x1c4] ss:$8 sps:$4 sm:$0xff]   ;;  %1220 = vmatprep.mubr.bf16.mxu1 %v2291_v50  ;;  %v2273_v56 = vld [vmem:[%s2795_s25 + $0x1d4] ss:$8 sps:$4 sm:$0xff]   ;;  %v2276_v58 = vld [vmem:[%s2795_s25 + $0x1d0] ss:$8 sps:$4 sm:$0xff]  }
  0x9b   : > { %1310 = vmatpush1.bf16.msra.mxu0 %v2222_v20  ;;  %1198 = vmatprep.subr.bf16.mxu1 %v2223_v21  ;;  %v2294_v52 = vld [vmem:[%s2788_s24 + $0xc] ss:$24 sps:$4 sm:$0xff]   ;;  %v2281_v61 = vld [vmem:[%s2795_s25 + $0xe0] ss:$8 sps:$4 sm:$0xff]   ;;  %v2283_v63 = vld [vmem:[%s2795_s25 + $0xf4] ss:$8 sps:$4 sm:$0xff]  }
  0x9c   : > { %1311 = vmatprep.subr.bf16.mxu0 %v2225_v22  ;;  %1333 = vmatprep.mubr.bf16.mxu0 %v2294_v52  ;;  %v2277_v59 = vld [vmem:[%s2795_s25 + $0xe4] ss:$8 sps:$4 sm:$0xff]   ;;  %v2282_v62 = vld [vmem:[%s2795_s25 + $0x1e0] ss:$8 sps:$4 sm:$0xff]   ;;  %v2285_v0 = vld [vmem:[%s2795_s25 + $0x1f4] ss:$8 sps:$4 sm:$0xff]  }
  0x9d   : > { %v2279_v60 = vld [vmem:[%s2795_s25 + $0x1e4] ss:$8 sps:$4 sm:$0xff]   ;;  %v2287_v1 = vld [vmem:[%s2795_s25 + $0xf0] ss:$8 sps:$4 sm:$0xff]   ;;  %v2292_v5 = vld [vmem:[%s2788_s24 + $0x8] ss:$24 sps:$4 sm:$0xff]  }
  0x9e   : > { %1199 = vmatpush1.bf16.msra.mxu1 %v2227_v23  ;;  %v2288_v2 = vld [vmem:[%s2795_s25 + $0x1f0] ss:$8 sps:$4 sm:$0xff]   ;;  %v2297_v3 = vld [vmem:[%s2795_s25 + $0x204] ss:$8 sps:$4 sm:$0xff]   ;;  %v2295_v6 = vld [vmem:[%s2795_s25 + $0x200] ss:$8 sps:$4 sm:$0xff]  }
  0x9f   : > { %1312 = vmatpush1.bf16.msra.mxu0 %v2228_v24  ;;  %1200 = vmatprep.subr.bf16.mxu1 %v2229_v25  ;;  %v2289_v4 = vld [vmem:[%s2788_s24] ss:$24 sps:$4 sm:$0xff]   ;;  %v2300_v7 = vld [vmem:[%s2795_s25 + $0x214] ss:$8 sps:$4 sm:$0xff]   ;;  %v2309_v11 = vld [vmem:[%s2795_s25 + $0x224] ss:$8 sps:$4 sm:$0xff]  }
  0xa0   : > { %1313 = vmatprep.subr.bf16.mxu0 %v2231_v26  ;;  %v2301_v8 = vld [vmem:[%s2788_s24 + $0x34] ss:$24 sps:$4 sm:$0xff]   ;;  %v2298_v10 = vld [vmem:[%s2795_s25 + $0x210] ss:$8 sps:$4 sm:$0xff]   ;;  %v2307_v14 = vld [vmem:[%s2795_s25 + $0x220] ss:$8 sps:$4 sm:$0xff]  }
  0xa1   : > { %v2303_v9 = vld [vmem:[%s2788_s24 + $0x3c] ss:$24 sps:$4 sm:$0xff]   ;;  %v2305_v12 = vld [vmem:[%s2788_s24 + $0x30] ss:$24 sps:$4 sm:$0xff]   ;;  %v2315_v17 = vld [vmem:[%s2788_s24 + $0x6c] ss:$24 sps:$4 sm:$0xff]  }
  0xa2   : > { %1201 = vmatpush1.bf16.msra.mxu1 %v2233_v27  ;;  %v2306_v13 = vld [vmem:[%s2788_s24 + $0x38] ss:$24 sps:$4 sm:$0xff]   ;;  %v2312_v15 = vld [vmem:[%s2795_s25 + $0x234] ss:$8 sps:$4 sm:$0xff]   ;;  %v2321_v19 = vld [vmem:[%s2795_s25 + $0x244] ss:$8 sps:$4 sm:$0xff]  }
  0xa3   : > { %1314 = vmatpush1.bf16.msra.mxu0 %v2234_v28  ;;  %1202 = vmatprep.subr.bf16.mxu1 %v2235_v29  ;;  %v2313_v16 = vld [vmem:[%s2788_s24 + $0x64] ss:$24 sps:$4 sm:$0xff]   ;;  %v2310_v18 = vld [vmem:[%s2795_s25 + $0x230] ss:$8 sps:$4 sm:$0xff]   ;;  %v2318_v21 = vld [vmem:[%s2788_s24 + $0x68] ss:$24 sps:$4 sm:$0xff]  }
  0xa4   : > { %1315 = vmatprep.subr.bf16.mxu0 %v2237_v30  ;;  %v2317_v20 = vld [vmem:[%s2788_s24 + $0x60] ss:$24 sps:$4 sm:$0xff]   ;;  %v2324_v23 = vld [vmem:[%s2795_s25 + $0x254] ss:$8 sps:$4 sm:$0xff]   ;;  %v2333_v27 = vld [vmem:[%s2795_s25 + $0x264] ss:$8 sps:$4 sm:$0xff]  }
  0xa5   : > { %v2319_v22 = vld [vmem:[%s2795_s25 + $0x240] ss:$8 sps:$4 sm:$0xff]   ;;  %v2325_v24 = vld [vmem:[%s2788_s24 + $0x94] ss:$24 sps:$4 sm:$0xff]   ;;  %v2322_v26 = vld [vmem:[%s2795_s25 + $0x250] ss:$8 sps:$4 sm:$0xff]  }
  0xa6   : > { %1203 = vmatpush1.bf16.msra.mxu1 %v2239_v31  ;;  %v2327_v25 = vld [vmem:[%s2788_s24 + $0x9c] ss:$24 sps:$4 sm:$0xff]   ;;  %v2329_v28 = vld [vmem:[%s2788_s24 + $0x90] ss:$24 sps:$4 sm:$0xff]   ;;  %v2365_v52 = vld [vmem:[%s2788_s24 + $0x120] ss:$24 sps:$4 sm:$0xff]  }
  0xa7   : > { %1316 = vmatpush1.bf16.msra.mxu0 %v2240_v32  ;;  %1204 = vmatprep.subr.bf16.mxu1 %v2241_v33  ;;  %v2330_v29 = vld [vmem:[%s2788_s24 + $0x98] ss:$24 sps:$4 sm:$0xff]   ;;  %v2331_v30 = vld [vmem:[%s2795_s25 + $0x260] ss:$8 sps:$4 sm:$0xff]   ;;  %v2336_v31 = vld [vmem:[%s2795_s25 + $0x274] ss:$8 sps:$4 sm:$0xff]  }
  0xa8   : > { %1317 = vmatprep.subr.bf16.mxu0 %v2243_v34  ;;  %v2337_v32 = vld [vmem:[%s2788_s24 + $0xc4] ss:$24 sps:$4 sm:$0xff]   ;;  %v2334_v34 = vld [vmem:[%s2795_s25 + $0x270] ss:$8 sps:$4 sm:$0xff]   ;;  %p1998_p6 = scmp.ne.s32.totalorder %s2577_s15, 8 }
  0xa9   : > { %v2339_v33 = vld [vmem:[%s2788_s24 + $0xcc] ss:$24 sps:$4 sm:$0xff]   ;;  %v2358_v50 = vld [vmem:[%s2795_s25 + $0x2b0] ss:$8 sps:$4 sm:$0xff]  }
  0xaa   : > { %1205 = vmatpush1.bf16.msra.mxu1 %v2245_v35  ;;  %v2345_v35 = vld [vmem:[%s2795_s25 + $0x284] ss:$8 sps:$4 sm:$0xff]  }
  0xab   : > { %1318 = vmatpush1.bf16.msra.mxu0 %v2246_v36  ;;  %1206 = vmatprep.subr.bf16.mxu1 %v2247_v37  ;;  %v2341_v36 = vld [vmem:[%s2788_s24 + $0xc0] ss:$24 sps:$4 sm:$0xff]  }
  0xac   : > { %1319 = vmatprep.subr.bf16.mxu0 %v2249_v38  ;;  %v2342_v37 = vld [vmem:[%s2788_s24 + $0xc8] ss:$24 sps:$4 sm:$0xff]  }
  0xad   : > { %v2343_v38 = vld [vmem:[%s2795_s25 + $0x280] ss:$8 sps:$4 sm:$0xff]  }
  0xae   : > { %1207 = vmatpush1.bf16.msra.mxu1 %v2251_v39  ;;  %v2348_v39 = vld [vmem:[%s2795_s25 + $0x294] ss:$8 sps:$4 sm:$0xff]  }
  0xaf   : > { %1320 = vmatpush1.bf16.msra.mxu0 %v2252_v40  ;;  %1208 = vmatprep.subr.bf16.mxu1 %v2253_v41  ;;  %v2349_v40 = vld [vmem:[%s2788_s24 + $0xf4] ss:$24 sps:$4 sm:$0xff]  }
  0xb0   : > { %1321 = vmatprep.subr.bf16.mxu0 %v2255_v42  ;;  %v2351_v41 = vld [vmem:[%s2788_s24 + $0xfc] ss:$24 sps:$4 sm:$0xff]   ;;  %v2346_v42 = vld [vmem:[%s2795_s25 + $0x290] ss:$8 sps:$4 sm:$0xff]  }
  0xb2   : > { %1209 = vmatpush1.bf16.msra.mxu1 %v2257_v43  ;;  %v2357_v43 = vld [vmem:[%s2795_s25 + $0x2a4] ss:$8 sps:$4 sm:$0xff]  }
  0xb3   : > { %1322 = vmatpush1.bf16.msra.mxu0 %v2258_v44  ;;  %1210 = vmatprep.subr.bf16.mxu1 %v2259_v45  ;;  %v2353_v44 = vld [vmem:[%s2788_s24 + $0xf0] ss:$24 sps:$4 sm:$0xff]  }
  0xb4   : > { %1323 = vmatprep.subr.bf16.mxu0 %v2261_v46  ;;  %v2354_v45 = vld [vmem:[%s2788_s24 + $0xf8] ss:$24 sps:$4 sm:$0xff]   ;;  %v2355_v46 = vld [vmem:[%s2795_s25 + $0x2a0] ss:$8 sps:$4 sm:$0xff]  }
  0xb6   : > { %1211 = vmatpush1.bf16.msra.mxu1 %v2263_v47  ;;  %v2360_v47 = vld [vmem:[%s2795_s25 + $0x2b4] ss:$8 sps:$4 sm:$0xff]  }
  0xb7   : > { %1324 = vmatpush1.bf16.msra.mxu0 %v2264_v48  ;;  %1212 = vmatprep.subr.bf16.mxu1 %v2265_v49  ;;  %v2361_v48 = vld [vmem:[%s2788_s24 + $0x124] ss:$24 sps:$4 sm:$0xff]  }
  0xb8   : > { %1325 = vmatprep.subr.bf16.mxu0 %v2267_v51  ;;  %v2363_v49 = vld [vmem:[%s2788_s24 + $0x12c] ss:$24 sps:$4 sm:$0xff]  }
  0xb9   : > { %v2369_v51 = vld [vmem:[%s2795_s25 + $0x2c4] ss:$8 sps:$4 sm:$0xff]  }
  0xba   : > { %1213 = vmatpush1.bf16.msra.mxu1 %v2269_v53  ;;  %v2366_v53 = vld [vmem:[%s2788_s24 + $0x128] ss:$24 sps:$4 sm:$0xff]  }
  0xbb   : > { %1326 = vmatpush1.bf16.msra.mxu0 %v2270_v54  ;;  %1214 = vmatprep.subr.bf16.mxu1 %v2271_v55  ;;  %v2367_v54 = vld [vmem:[%s2795_s25 + $0x2c0] ss:$8 sps:$4 sm:$0xff]   ;;  %v2372_v55 = vld [vmem:[%s2795_s25 + $0x2d4] ss:$8 sps:$4 sm:$0xff]  }
  0xbc   : > { %1327 = vmatprep.subr.bf16.mxu0 %v2273_v56  ;;  %v2373_v56 = vld [vmem:[%s2788_s24 + $0x154] ss:$24 sps:$4 sm:$0xff]  }
  0xbe   : > { %1215 = vmatpush1.bf16.msra.mxu1 %v2275_v57  ;;  %v2375_v57 = vld [vmem:[%s2788_s24 + $0x15c] ss:$24 sps:$4 sm:$0xff]  }
  0xbf   : > { %1328 = vmatpush1.bf16.msra.mxu0 %v2276_v58  ;;  %1216 = vmatprep.subr.bf16.mxu1 %v2277_v59  ;;  %v2370_v58 = vld [vmem:[%s2795_s25 + $0x2d0] ss:$8 sps:$4 sm:$0xff]   ;;  %v2381_v59 = vld [vmem:[%s2795_s25 + $0x2e4] ss:$8 sps:$4 sm:$0xff]  }
  0xc0   : > { %1329 = vmatprep.subr.bf16.mxu0 %v2279_v60  ;;  %v2377_v60 = vld [vmem:[%s2788_s24 + $0x150] ss:$24 sps:$4 sm:$0xff]  }
  0xc2   : > { %1217 = vmatpush1.bf16.msra.mxu1 %v2281_v61  ;;  %v2378_v61 = vld [vmem:[%s2788_s24 + $0x158] ss:$24 sps:$4 sm:$0xff]  }
  0xc3   : > { %1330 = vmatpush1.bf16.msra.mxu0 %v2282_v62  ;;  %1218 = vmatprep.subr.bf16.mxu1 %v2283_v63  ;;  %v2379_v62 = vld [vmem:[%s2795_s25 + $0x2e0] ss:$8 sps:$4 sm:$0xff]   ;;  %v2384_v63 = vld [vmem:[%s2795_s25 + $0x2f4] ss:$8 sps:$4 sm:$0xff]  }
  0xc4   : > { %1331 = vmatprep.subr.bf16.mxu0 %v2285_v0  ;;  %v2387_v0 = vld [vmem:[%s2788_s24 + $0x14] ss:$24 sps:$4 sm:$0xff]  }
  0xc6   : > { %1219 = vmatpush1.bf16.msra.mxu1 %v2287_v1  ;;  %v2390_v1 = vld [vmem:[%s2788_s24 + $0xd4] ss:$24 sps:$4 sm:$0xff]  }
  0xc7   : > { %1332 = vmatpush1.bf16.msra.mxu0 %v2288_v2  ;;  %2007 = vmatprep.subr.bf16.mxu1 %v2297_v3  ;;  %v2382_v2 = vld [vmem:[%s2795_s25 + $0x2f0] ss:$8 sps:$4 sm:$0xff]  }
  0xc8   : > { %1414 = vmatprep.subr.bf16.mxu0 %v2297_v3  ;;  %v2385_v3 = vld [vmem:[%s2788_s24 + $0x10] ss:$24 sps:$4 sm:$0xff]  }
  0xc9   : > { %1221 = vmatmul.mubr.bf16.vlgmr.msra.gmra.mrb[0].mxu1 %v2289_v4  ;;  %v2388_v4 = vld [vmem:[%s2788_s24 + $0xd0] ss:$24 sps:$4 sm:$0xff]  }
  0xca   : > { %1334 = vmatmul.mubr.bf16.vlgmr.msra.gmra.mrb[0].mxu0 %v2292_v5  ;;  %2023 = vmatpush1.bf16.msra.mxu1 %v2295_v6  ;;  %v2391_v5 = vld [vmem:[%s2788_s24 + $0x44] ss:$24 sps:$4 sm:$0xff]  }
  0xcb   : > { %1415 = vmatpush1.bf16.msra.mxu0 %v2295_v6  ;;  %2008 = vmatprep.subr.bf16.mxu1 %v2300_v7  ;;  %v2393_v6 = vld [vmem:[%s2788_s24 + $0x104] ss:$24 sps:$4 sm:$0xff]  }
  0xcc   : > { %1416 = vmatprep.subr.bf16.mxu0 %v2300_v7  ;;  %1230 = vmatprep.mubr.bf16.mxu1 %v2301_v8  ;;  %v2395_v7 = vld [vmem:[%s2788_s24 + $0x40] ss:$24 sps:$4 sm:$0xff]  }
  0xcd   : > { %1343 = vmatprep.mubr.bf16.mxu0 %v2303_v9  ;;  %v2396_v8 = vld [vmem:[%s2788_s24 + $0x100] ss:$24 sps:$4 sm:$0xff]   ;;  %v2397_v9 = vld [vmem:[%s2788_s24 + $0x74] ss:$24 sps:$4 sm:$0xff]  }
  0xce   : > { %2024 = vmatpush1.bf16.msra.mxu1 %v2298_v10 }
  0xcf   : > { %1417 = vmatpush1.bf16.msra.mxu0 %v2298_v10  ;;  %2009 = vmatprep.subr.bf16.mxu1 %v2309_v11  ;;  %v2399_v10 = vld [vmem:[%s2788_s24 + $0x134] ss:$24 sps:$4 sm:$0xff]  }
  0xd0   : > { %1418 = vmatprep.subr.bf16.mxu0 %v2309_v11  ;;  %v2401_v11 = vld [vmem:[%s2788_s24 + $0x70] ss:$24 sps:$4 sm:$0xff]  }
  0xd1   : > { %1231 = vmatmul.mubr.bf16.gmra.mrb[4].mxu1 %v2305_v12  ;;  %v2402_v12 = vld [vmem:[%s2788_s24 + $0x130] ss:$24 sps:$4 sm:$0xff]  }
  0xd2   : > { %1344 = vmatmul.mubr.bf16.gmra.mrb[4].mxu0 %v2306_v13  ;;  %2025 = vmatpush1.bf16.msra.mxu1 %v2307_v14  ;;  %v2403_v13 = vld [vmem:[%s2788_s24 + $0xa4] ss:$24 sps:$4 sm:$0xff]  }
  0xd3   : > { %1419 = vmatpush1.bf16.msra.mxu0 %v2307_v14  ;;  %2010 = vmatprep.subr.bf16.mxu1 %v2312_v15  ;;  %v2405_v14 = vld [vmem:[%s2788_s24 + $0x164] ss:$24 sps:$4 sm:$0xff]  }
  0xd4   : > { %1420 = vmatprep.subr.bf16.mxu0 %v2312_v15  ;;  %1240 = vmatprep.mubr.bf16.mxu1 %v2313_v16  ;;  %v2407_v15 = vld [vmem:[%s2788_s24 + $0xa0] ss:$24 sps:$4 sm:$0xff]  }
  0xd5   : > { %1353 = vmatprep.mubr.bf16.mxu0 %v2315_v17  ;;  %v2408_v16 = vld [vmem:[%s2788_s24 + $0x160] ss:$24 sps:$4 sm:$0xff]  }
  0xd6   : > { %2026 = vmatpush1.bf16.msra.mxu1 %v2310_v18 }
  0xd7   : > { %1421 = vmatpush1.bf16.msra.mxu0 %v2310_v18  ;;  %2011 = vmatprep.subr.bf16.mxu1 %v2321_v19 }
  0xd8   : > { %1422 = vmatprep.subr.bf16.mxu0 %v2321_v19 }
  0xd9   : > { %1241 = vmatmul.mubr.bf16.gmra.mrb[8].mxu1 %v2317_v20 }
  0xda   : > { %1354 = vmatmul.mubr.bf16.gmra.mrb[8].mxu0 %v2318_v21  ;;  %2027 = vmatpush1.bf16.msra.mxu1 %v2319_v22 }
  0xdb   : > { %1423 = vmatpush1.bf16.msra.mxu0 %v2319_v22  ;;  %2012 = vmatprep.subr.bf16.mxu1 %v2324_v23 }
  0xdc   : > { %1424 = vmatprep.subr.bf16.mxu0 %v2324_v23  ;;  %1250 = vmatprep.mubr.bf16.mxu1 %v2325_v24 }
  0xdd   : > { %1363 = vmatprep.mubr.bf16.mxu0 %v2327_v25 }
  0xde   : > { %2028 = vmatpush1.bf16.msra.mxu1 %v2322_v26 }
  0xdf   : > { %1425 = vmatpush1.bf16.msra.mxu0 %v2322_v26  ;;  %2013 = vmatprep.subr.bf16.mxu1 %v2333_v27 }
  0xe0   : > { %1426 = vmatprep.subr.bf16.mxu0 %v2333_v27 }
  0xe1   : > { %1251 = vmatmul.mubr.bf16.gmra.mrb[12].mxu1 %v2329_v28 }
  0xe2   : > { %1364 = vmatmul.mubr.bf16.gmra.mrb[12].mxu0 %v2330_v29  ;;  %2029 = vmatpush1.bf16.msra.mxu1 %v2331_v30 }
  0xe3   : > { %1427 = vmatpush1.bf16.msra.mxu0 %v2331_v30  ;;  %2014 = vmatprep.subr.bf16.mxu1 %v2336_v31 }
  0xe4   : > { %1428 = vmatprep.subr.bf16.mxu0 %v2336_v31  ;;  %1260 = vmatprep.mubr.bf16.mxu1 %v2337_v32 }
  0xe5   : > { %1373 = vmatprep.mubr.bf16.mxu0 %v2339_v33 }
  0xe6   : > { %2030 = vmatpush1.bf16.msra.mxu1 %v2334_v34 }
  0xe7   : > { %1429 = vmatpush1.bf16.msra.mxu0 %v2334_v34  ;;  %2015 = vmatprep.subr.bf16.mxu1 %v2345_v35 }
  0xe8   : > { %1430 = vmatprep.subr.bf16.mxu0 %v2345_v35 }
  0xe9   : > { %1261 = vmatmul.mubr.bf16.gmra.mrb[16].mxu1 %v2341_v36 }
  0xea   : > { %1374 = vmatmul.mubr.bf16.gmra.mrb[16].mxu0 %v2342_v37  ;;  %2031 = vmatpush1.bf16.msra.mxu1 %v2343_v38 }
  0xeb   : > { %1431 = vmatpush1.bf16.msra.mxu0 %v2343_v38  ;;  %2016 = vmatprep.subr.bf16.mxu1 %v2348_v39 }
  0xec   : > { %1432 = vmatprep.subr.bf16.mxu0 %v2348_v39  ;;  %1270 = vmatprep.mubr.bf16.mxu1 %v2349_v40 }
  0xed   : > { %1383 = vmatprep.mubr.bf16.mxu0 %v2351_v41 }
  0xee   : > { %2032 = vmatpush1.bf16.msra.mxu1 %v2346_v42 }
  0xef   : > { %1433 = vmatpush1.bf16.msra.mxu0 %v2346_v42  ;;  %2017 = vmatprep.subr.bf16.mxu1 %v2357_v43 }
  0xf0   : > { %1434 = vmatprep.subr.bf16.mxu0 %v2357_v43 }
  0xf1   : > { %1271 = vmatmul.mubr.bf16.gmra.mrb[20].mxu1 %v2353_v44 }
  0xf2   : > { %1384 = vmatmul.mubr.bf16.gmra.mrb[20].mxu0 %v2354_v45  ;;  %2033 = vmatpush1.bf16.msra.mxu1 %v2355_v46 }
  0xf3   : > { %1435 = vmatpush1.bf16.msra.mxu0 %v2355_v46  ;;  %2018 = vmatprep.subr.bf16.mxu1 %v2360_v47 }
  0xf4   : > { %1436 = vmatprep.subr.bf16.mxu0 %v2360_v47  ;;  %1280 = vmatprep.mubr.bf16.mxu1 %v2361_v48 }
  0xf5   : > { %1393 = vmatprep.mubr.bf16.mxu0 %v2363_v49 }
  0xf6   : > { %2034 = vmatpush1.bf16.msra.mxu1 %v2358_v50 }
  0xf7   : > { %1437 = vmatpush1.bf16.msra.mxu0 %v2358_v50  ;;  %2019 = vmatprep.subr.bf16.mxu1 %v2369_v51 }
  0xf8   : > { %1438 = vmatprep.subr.bf16.mxu0 %v2369_v51 }
  0xf9   : > { %1281 = vmatmul.mubr.bf16.gmra.mrb[24].mxu1 %v2365_v52 }
  0xfa   : > { %1394 = vmatmul.mubr.bf16.gmra.mrb[24].mxu0 %v2366_v53  ;;  %2035 = vmatpush1.bf16.msra.mxu1 %v2367_v54 }
  0xfb   : > { %1439 = vmatpush1.bf16.msra.mxu0 %v2367_v54  ;;  %2020 = vmatprep.subr.bf16.mxu1 %v2372_v55 }
  0xfc   : > { %1440 = vmatprep.subr.bf16.mxu0 %v2372_v55  ;;  %1290 = vmatprep.mubr.bf16.mxu1 %v2373_v56 }
  0xfd   : > { %1403 = vmatprep.mubr.bf16.mxu0 %v2375_v57 }
  0xfe   : > { %2036 = vmatpush1.bf16.msra.mxu1 %v2370_v58 }
  0xff   : > { %1441 = vmatpush1.bf16.msra.mxu0 %v2370_v58  ;;  %2021 = vmatprep.subr.bf16.mxu1 %v2381_v59 }
 0x100   : > { %1442 = vmatprep.subr.bf16.mxu0 %v2381_v59 }
 0x101   : > { %1291 = vmatmul.mubr.bf16.gmra.mrb[28].mxu1 %v2377_v60 }
 0x102   : > { %1404 = vmatmul.mubr.bf16.gmra.mrb[28].mxu0 %v2378_v61  ;;  %2037 = vmatpush1.bf16.msra.mxu1 %v2379_v62 }
 0x103   : > { %1443 = vmatpush1.bf16.msra.mxu0 %v2379_v62  ;;  %2022 = vmatprep.subr.bf16.mxu1 %v2384_v63 }
 0x104   : > { %1444 = vmatprep.subr.bf16.mxu0 %v2384_v63  ;;  %1446 = vmatprep.mubr.bf16.mxu0 %v2387_v0 }
 0x105   : > { %1486 = vmatprep.mubr.bf16.mxu1 %v2390_v1 }
 0x106   : > { %2038 = vmatpush1.bf16.msra.mxu1 %v2382_v2 }
 0x107   : > { %1445 = vmatpush1.bf16.msra.mxu0 %v2382_v2 }
 0x109   : > { %1487 = vmatmul.mubr.bf16.vlgmr.msra.gmra.mrb[32].mxu1 %v2388_v4 }
 0x10a   : > { %1447 = vmatmul.mubr.bf16.vlgmr.msra.gmra.mrb[0].mxu0 %v2385_v3  ;;  %1496 = vmatprep.mubr.bf16.mxu1 %v2393_v6 }
 0x10b   : > { %1456 = vmatprep.mubr.bf16.mxu0 %v2391_v5 }
 0x111   : > { %1497 = vmatmul.mubr.bf16.gmra.mrb[36].mxu1 %v2396_v8 }
 0x112   : > { %1457 = vmatmul.mubr.bf16.gmra.mrb[4].mxu0 %v2395_v7  ;;  %1506 = vmatprep.mubr.bf16.mxu1 %v2399_v10 }
 0x113   : > { %1466 = vmatprep.mubr.bf16.mxu0 %v2397_v9 }
 0x119   : > { %1507 = vmatmul.mubr.bf16.gmra.mrb[40].mxu1 %v2402_v12 }
 0x11a   : > { %1467 = vmatmul.mubr.bf16.gmra.mrb[8].mxu0 %v2401_v11  ;;  %1516 = vmatprep.mubr.bf16.mxu1 %v2405_v14 }
 0x11b   : > { %1476 = vmatprep.mubr.bf16.mxu0 %v2403_v13 }
 0x121   : > { %1517 = vmatmul.mubr.bf16.gmra.mrb[44].mxu1 %v2408_v16 }
 0x122   : > { %1477 = vmatmul.mubr.bf16.gmra.mrb[12].mxu0 %v2407_v15 }
 0x19c   : > { %v2950_v17 = vpop.f32.mrb[0].mxu1 }
 0x19d   : > { %v2952_v18 = vpop.f32.mrb[1].mxu1 }
 0x19e   : > { %v2954_v19 = vpop.f32.mrb[2].mxu1 }
 0x19f   : > { %v2956_v20 = vpop.f32.mrb[3].mxu1 }
 0x1a4   : > { %v2958_v21 = vpop.f32.mrb[4].mxu1 }
 0x1a5   : > { %v2960_v22 = vpop.f32.mrb[5].mxu1 }
 0x1a6   : > { %v2962_v23 = vpop.f32.mrb[6].mxu1 }
 0x1a7   : > { %v2964_v24 = vpop.f32.mrb[7].mxu1 }
 0x1ac   : > { %v2966_v25 = vpop.f32.mrb[8].mxu1 }
 0x1ad   : > { %v2968_v26 = vpop.f32.mrb[9].mxu1 }
 0x1ae   : > { %v2970_v27 = vpop.f32.mrb[10].mxu1 }
 0x1af   : > { %v2972_v28 = vpop.f32.mrb[11].mxu1 }
 0x1b4   : > { %v2974_v29 = vpop.f32.mrb[12].mxu1 }
 0x1b5   : > { %v2976_v30 = vpop.f32.mrb[13].mxu1 }
 0x1b6   : > { %v2978_v31 = vpop.f32.mrb[14].mxu1 }
 0x1b7   : > { %v2980_v32 = vpop.f32.mrb[15].mxu1 }
 0x1bc   : > { %v1262_v33 = vpop.f32.mrb[16].mxu1 }
 0x1bd   : > { %v1375_v34 = vpop.f32.mrb[16].mxu0  ;;  %v1264_v36 = vpop.f32.mrb[17].mxu1 }
 0x1be   : > { %v1376_v35 = vadd.f32 %v1375_v34, %v1262_v33  ;;  %v1377_v37 = vpop.f32.mrb[17].mxu0  ;;  %v1266_v39 = vpop.f32.mrb[18].mxu1  ;;  %v292_v33 = vld [vmem:[#allocation8] sm:$0xff] }
 0x1bf   : > { %v1378_v38 = vadd.f32 %v1377_v37, %v1264_v36  ;;  %v1379_v40 = vpop.f32.mrb[18].mxu0  ;;  %v1268_v42 = vpop.f32.mrb[19].mxu1  ;;  %v308_v36 = vld [vmem:[#allocation8 + $0x80] sm:$0xff] }
 0x1c0   : > { %v1380_v41 = vadd.f32 %v1379_v40, %v1266_v39  ;;  %v1381_v43 = vpop.f32.mrb[19].mxu0 }
 0x1c1   : > { %v2982_v44 = vadd.f32 %v1381_v43, %v1268_v42  ;;  %v293_v42 = vld [vmem:[#allocation8 + $0x8] sm:$0xff] }
 0x1c4   : > { %v1272_v45 = vpop.f32.mrb[20].mxu1 }
 0x1c5   : > { %v1385_v46 = vpop.f32.mrb[20].mxu0  ;;  %v1274_v48 = vpop.f32.mrb[21].mxu1 }
 0x1c6   : > { %v2984_v47 = vadd.f32 %v1385_v46, %v1272_v45  ;;  %v1387_v49 = vpop.f32.mrb[21].mxu0  ;;  %v1276_v51 = vpop.f32.mrb[22].mxu1  ;;  %v309_v45 = vld [vmem:[#allocation8 + $0x88] sm:$0xff] }
 0x1c7   : > { %v2986_v50 = vadd.f32 %v1387_v49, %v1274_v48  ;;  %v1389_v52 = vpop.f32.mrb[22].mxu0  ;;  %v1278_v54 = vpop.f32.mrb[23].mxu1 }
 0x1c8   : > { %v2988_v53 = vadd.f32 %v1389_v52, %v1276_v51  ;;  %v1391_v55 = vpop.f32.mrb[23].mxu0  ;;  %v294_v51 = vld [vmem:[#allocation8 + $0x10] sm:$0xff] }
 0x1c9   : > { %v2990_v56 = vadd.f32 %v1391_v55, %v1278_v54  ;;  %v310_v54 = vld [vmem:[#allocation8 + $0x90] sm:$0xff] }
 0x1cc   : > { %v1282_v57 = vpop.f32.mrb[24].mxu1 }
 0x1cd   : > { %v1395_v58 = vpop.f32.mrb[24].mxu0  ;;  %v1284_v60 = vpop.f32.mrb[25].mxu1 }
 0x1ce   : > { %v2992_v59 = vadd.f32 %v1395_v58, %v1282_v57  ;;  %v1397_v61 = vpop.f32.mrb[25].mxu0  ;;  %v1286_v63 = vpop.f32.mrb[26].mxu1 }
 0x1cf   : > { %v2994_v62 = vadd.f32 %v1397_v61, %v1284_v60  ;;  %v1399_v0 = vpop.f32.mrb[26].mxu0  ;;  %v1288_v2 = vpop.f32.mrb[27].mxu1 }
 0x1d0   : > { %v2996_v1 = vadd.f32 %v1399_v0, %v1286_v63  ;;  %v1401_v3 = vpop.f32.mrb[27].mxu0  ;;  %v295_v63 = vld [vmem:[#allocation8 + $0x18] sm:$0xff] }
 0x1d1   : > { %v2998_v4 = vadd.f32 %v1401_v3, %v1288_v2 }
 0x1d4   : > { %v1292_v5 = vpop.f32.mrb[28].mxu1 }
 0x1d5   : > { %v1405_v6 = vpop.f32.mrb[28].mxu0  ;;  %v1294_v8 = vpop.f32.mrb[29].mxu1 }
 0x1d6   : > { %v3000_v7 = vadd.f32 %v1405_v6, %v1292_v5  ;;  %v1407_v9 = vpop.f32.mrb[29].mxu0  ;;  %v1296_v11 = vpop.f32.mrb[30].mxu1 }
 0x1d7   : > { %v3002_v10 = vadd.f32 %v1407_v9, %v1294_v8  ;;  %v1409_v12 = vpop.f32.mrb[30].mxu0  ;;  %v1298_v14 = vpop.f32.mrb[31].mxu1 }
 0x1d8   : > { %v3004_v13 = vadd.f32 %v1409_v12, %v1296_v11  ;;  %v1411_v15 = vpop.f32.mrb[31].mxu0  ;;  %v312_v11 = vld [vmem:[#allocation8 + $0xa0] sm:$0xff] }
 0x1d9   : > { %v3006_v16 = vadd.f32 %v1411_v15, %v1298_v14  ;;  %v297_v14 = vld [vmem:[#allocation8 + $0x28] sm:$0xff] }
 0x1dc   : > { %v1488_v37 = vpop.f32.mrb[32].mxu1 }
 0x1dd   : > { %v1448_v34 = vpop.f32.mrb[0].mxu0  ;;  %v1489_v40 = vadd.f32 %v1488_v37, %v1376_v35  ;;  %v1490_v46 = vpop.f32.mrb[33].mxu1 }
 0x1de   : > { %v2039_v39 = vadd.f32 %v1448_v34, %v2950_v17  ;;  %v1450_v43 = vpop.f32.mrb[1].mxu0  ;;  %v1491_v49 = vadd.f32 %v1490_v46, %v1378_v38  ;;  %v1492_v55 = vpop.f32.mrb[34].mxu1  ;;  %v311_v17 = vld [vmem:[#allocation8 + $0x98] sm:$0xff] }
 0x1df   : > { %v2040_v48 = vadd.f32 %v1450_v43, %v2952_v18  ;;  %v1452_v52 = vpop.f32.mrb[2].mxu0  ;;  %v1543_v58 = vadd.f32 %v1489_v40, %v308_v36  ;;  %v1493_v61 = vadd.f32 %v1492_v55, %v1380_v41  ;;  %v1494_v35 = vpop.f32.mrb[35].mxu1 }
 0x1e0   : > { %v1527_v57 = vadd.f32 %v2039_v39, %v292_v33  ;;  %v2041_v60 = vadd.f32 %v1452_v52, %v2954_v19  ;;  %v1454_v0 = vpop.f32.mrb[3].mxu0  ;;  %v1544_v3 = vadd.f32 %v1491_v49, %v309_v45  ;;  %v1495_v18 = vadd.f32 %v1494_v35, %v2982_v44  ;;  %v296_v19 = vld [vmem:[#allocation8 + $0x20] sm:$0xff]  ;;  %v313_v33 = vld [vmem:[#allocation8 + $0xa8] sm:$0xff]  ;;  %v298_v39 = vld [vmem:[#allocation8 + $0x30] sm:$0xff] }
 0x1e1   : > { %v1528_v2 = vadd.f32 %v2040_v48, %v293_v42  ;;  %v2042_v5 = vadd.f32 %v1454_v0, %v2956_v20  ;;  %1575 = vst [vmem:[#allocation8 + $0x80] sm:$0xff] %v1543_v58  ;;  %v1545_v6 = vadd.f32 %v1493_v61, %v310_v54  ;;  %v314_v42 = vld [vmem:[#allocation8 + $0xb0] sm:$0xff]  ;;  %v299_v49 = vld [vmem:[#allocation8 + $0x38] sm:$0xff] }
 0x1e2   : > { %1559 = vst [vmem:[#allocation8] sm:$0xff] %v1527_v57  ;;  %v1529_v38 = vadd.f32 %v2041_v60, %v294_v51  ;;  %1576 = vst [vmem:[#allocation8 + $0x88] sm:$0xff] %v1544_v3  ;;  %v1546_v9 = vadd.f32 %v1495_v18, %v311_v17  ;;  %v315_v51 = vld [vmem:[#allocation8 + $0xb8] sm:$0xff]  ;;  %v301_v17 = vld [vmem:[#allocation8 + $0x48] sm:$0xff] }
 0x1e3   : > { %1560 = vst [vmem:[#allocation8 + $0x8] sm:$0xff] %v1528_v2  ;;  %v1530_v8 = vadd.f32 %v2042_v5, %v295_v63  ;;  %1577 = vst [vmem:[#allocation8 + $0x90] sm:$0xff] %v1545_v6  ;;  %v316_v63 = vld [vmem:[#allocation8 + $0xc0] sm:$0xff]  ;;  %v317_v2 = vld [vmem:[#allocation8 + $0xc8] sm:$0xff] }
 0x1e4   : > { %1561 = vst [vmem:[#allocation8 + $0x10] sm:$0xff] %v1529_v38  ;;  %1578 = vst [vmem:[#allocation8 + $0x98] sm:$0xff] %v1546_v9  ;;  %v1498_v12 = vpop.f32.mrb[36].mxu1  ;;  %v302_v38 = vld [vmem:[#allocation8 + $0x50] sm:$0xff] }
 0x1e5   : > { %1562 = vst [vmem:[#allocation8 + $0x18] sm:$0xff] %v1530_v8  ;;  %v1458_v41 = vpop.f32.mrb[4].mxu0  ;;  %v1499_v44 = vadd.f32 %v1498_v12, %v2984_v47  ;;  %v1500_v34 = vpop.f32.mrb[37].mxu1  ;;  %v318_v8 = vld [vmem:[#allocation8 + $0xd0] sm:$0xff]  ;;  %v303_v12 = vld [vmem:[#allocation8 + $0x58] sm:$0xff] }
 0x1e6   : > { %v2043_v20 = vadd.f32 %v1458_v41, %v2958_v21  ;;  %v1460_v15 = vpop.f32.mrb[5].mxu0  ;;  %v1501_v37 = vadd.f32 %v1500_v34, %v2986_v50  ;;  %v1502_v43 = vpop.f32.mrb[38].mxu1 }
 0x1e7   : > { %v2044_v36 = vadd.f32 %v1460_v15, %v2960_v22  ;;  %v1462_v40 = vpop.f32.mrb[6].mxu0  ;;  %v1547_v46 = vadd.f32 %v1499_v44, %v312_v11  ;;  %v1503_v21 = vadd.f32 %v1502_v43, %v2988_v53  ;;  %v1504_v52 = vpop.f32.mrb[39].mxu1  ;;  %v300_v53 = vld [vmem:[#allocation8 + $0x40] sm:$0xff] }
 0x1e8   : > { %v1531_v45 = vadd.f32 %v2043_v20, %v296_v19  ;;  %v2045_v48 = vadd.f32 %v1462_v40, %v2962_v23  ;;  %v1464_v47 = vpop.f32.mrb[7].mxu0  ;;  %v1548_v55 = vadd.f32 %v1501_v37, %v313_v33  ;;  %v1505_v50 = vadd.f32 %v1504_v52, %v2990_v56  ;;  %v319_v20 = vld [vmem:[#allocation8 + $0xd8] sm:$0xff] }
 0x1e9   : > { %v1532_v54 = vadd.f32 %v2044_v36, %v297_v14  ;;  %v2046_v22 = vadd.f32 %v1464_v47, %v2964_v24  ;;  %1579 = vst [vmem:[#allocation8 + $0xa0] sm:$0xff] %v1547_v46  ;;  %v1549_v58 = vadd.f32 %v1503_v21, %v314_v42  ;;  %v305_v42 = vld [vmem:[#allocation8 + $0x68] sm:$0xff] }
 0x1ea   : > { %1563 = vst [vmem:[#allocation8 + $0x20] sm:$0xff] %v1531_v45  ;;  %v1533_v57 = vadd.f32 %v2045_v48, %v298_v39  ;;  %1580 = vst [vmem:[#allocation8 + $0xa8] sm:$0xff] %v1548_v55  ;;  %v1550_v23 = vadd.f32 %v1505_v50, %v315_v51  ;;  %v320_v39 = vld [vmem:[#allocation8 + $0xe0] sm:$0xff]  ;;  %v321_v45 = vld [vmem:[#allocation8 + $0xe8] sm:$0xff] }
 0x1eb   : > { %1564 = vst [vmem:[#allocation8 + $0x28] sm:$0xff] %v1532_v54  ;;  %v1534_v60 = vadd.f32 %v2046_v22, %v299_v49  ;;  %1581 = vst [vmem:[#allocation8 + $0xb0] sm:$0xff] %v1549_v58  ;;  %v306_v49 = vld [vmem:[#allocation8 + $0x70] sm:$0xff]  ;;  %v307_v50 = vld [vmem:[#allocation8 + $0x78] sm:$0xff] }
 0x1ec   : > { %1565 = vst [vmem:[#allocation8 + $0x30] sm:$0xff] %v1533_v57  ;;  %1582 = vst [vmem:[#allocation8 + $0xb8] sm:$0xff] %v1550_v23  ;;  %v1508_v0 = vpop.f32.mrb[40].mxu1  ;;  %v322_v51 = vld [vmem:[#allocation8 + $0xf0] sm:$0xff]  ;;  %v323_v57 = vld [vmem:[#allocation8 + $0xf8] sm:$0xff] }
 0x1ed   : > { %1566 = vst [vmem:[#allocation8 + $0x38] sm:$0xff] %v1534_v60  ;;  %v1468_v61 = vpop.f32.mrb[8].mxu0  ;;  %v1509_v56 = vadd.f32 %v1508_v0, %v2992_v59  ;;  %v1510_v3 = vpop.f32.mrb[41].mxu1 }
 0x1ee   : > { %v2047_v24 = vadd.f32 %v1468_v61, %v2966_v25  ;;  %v1470_v35 = vpop.f32.mrb[9].mxu0  ;;  %v1511_v18 = vadd.f32 %v1510_v3, %v2994_v62  ;;  %v1512_v9 = vpop.f32.mrb[42].mxu1 }
 0x1ef   : > { %v2048_v5 = vadd.f32 %v1470_v35, %v2968_v26  ;;  %v1472_v6 = vpop.f32.mrb[10].mxu0  ;;  %v1551_v41 = vadd.f32 %v1509_v56, %v316_v63  ;;  %v1513_v25 = vadd.f32 %v1512_v9, %v2996_v1  ;;  %v1514_v44 = vpop.f32.mrb[43].mxu1  ;;  %v304_v1 = vld [vmem:[#allocation8 + $0x60] sm:$0xff]  ;;  %v1596_v56 = vld [vmem:[#allocation8 + $0x8] sm:$0xff] (!%p1998_p6)  ;;  %v1597_v35 = vld [vmem:[#allocation8 + $0x10] sm:$0xff] (!%p1998_p6) }
 0x1f0   : > { %v1535_v19 = vadd.f32 %v2047_v24, %v300_v53  ;;  %v2049_v11 = vadd.f32 %v1472_v6, %v2970_v27  ;;  %v1474_v59 = vpop.f32.mrb[11].mxu0  ;;  %v1552_v15 = vadd.f32 %v1511_v18, %v317_v2  ;;  %v1515_v62 = vadd.f32 %v1514_v44, %v2998_v4  ;;  %v1595_v24 = vld [vmem:[#allocation8] sm:$0xff] (!%p1998_p6)  ;;  %v1598_v2 = vld [vmem:[#allocation8 + $0x18] sm:$0xff] (!%p1998_p6) }
 0x1f1   : > { %v1536_v14 = vadd.f32 %v2048_v5, %v301_v17  ;;  %v2050_v26 = vadd.f32 %v1474_v59, %v2972_v28  ;;  %1583 = vst [vmem:[#allocation8 + $0xc0] sm:$0xff] %v1551_v41  ;;  %v1553_v34 = vadd.f32 %v1513_v25, %v318_v8  ;;  %v1599_v3 = vld [vmem:[#allocation8 + $0x20] sm:$0xff] (!%p1998_p6) }
 0x1f2   : > { %1567 = vst [vmem:[#allocation8 + $0x40] sm:$0xff] %v1535_v19  ;;  %v1537_v33 = vadd.f32 %v2049_v11, %v302_v38  ;;  %1584 = vst [vmem:[#allocation8 + $0xc8] sm:$0xff] %v1552_v15  ;;  %v1554_v27 = vadd.f32 %v1515_v62, %v319_v20  ;;  %v1600_v38 = vld [vmem:[#allocation8 + $0x28] sm:$0xff] (!%p1998_p6) }
 0x1f3   : > { %1568 = vst [vmem:[#allocation8 + $0x48] sm:$0xff] %v1536_v14  ;;  %v1538_v36 = vadd.f32 %v2050_v26, %v303_v12  ;;  %1585 = vst [vmem:[#allocation8 + $0xd0] sm:$0xff] %v1553_v34  ;;  %v1601_v6 = vld [vmem:[#allocation8 + $0x30] sm:$0xff] (!%p1998_p6) }
 0x1f4   : > { %1569 = vst [vmem:[#allocation8 + $0x50] sm:$0xff] %v1537_v33  ;;  %1586 = vst [vmem:[#allocation8 + $0xd8] sm:$0xff] %v1554_v27  ;;  %v1518_v40 = vpop.f32.mrb[44].mxu1  ;;  %v1602_v8 = vld [vmem:[#allocation8 + $0x38] sm:$0xff] (!%p1998_p6) }
 0x1f5   : > { %1570 = vst [vmem:[#allocation8 + $0x58] sm:$0xff] %v1538_v36  ;;  %v1478_v37 = vpop.f32.mrb[12].mxu0  ;;  %v1519_v4 = vadd.f32 %v1518_v40, %v3000_v7  ;;  %v1520_v46 = vpop.f32.mrb[45].mxu1 }
 0x1f6   : > { %v2051_v28 = vadd.f32 %v1478_v37, %v2974_v29  ;;  %v1480_v43 = vpop.f32.mrb[13].mxu0  ;;  %v1521_v21 = vadd.f32 %v1520_v46, %v3002_v10  ;;  %v1522_v52 = vpop.f32.mrb[46].mxu1 }
 0x1f7   : > { %v2052_v48 = vadd.f32 %v1480_v43, %v2976_v30  ;;  %v1482_v47 = vpop.f32.mrb[14].mxu0  ;;  %v1555_v55 = vadd.f32 %v1519_v4, %v320_v39  ;;  %v1523_v29 = vadd.f32 %v1522_v52, %v3004_v13  ;;  %v1524_v58 = vpop.f32.mrb[47].mxu1  ;;  %1594 = sbr.rel (%p1998_p6) target bundleno = 532 (0x214), region = 52  ;;  %v1629_v13 = vlaneseq (!%p1998_p6) }
 0x1f8   : > { %v1539_v54 = vadd.f32 %v2051_v28, %v304_v1  ;;  %v2053_v22 = vadd.f32 %v1482_v47, %v2978_v31  ;;  %v1484_v7 = vpop.f32.mrb[15].mxu0  ;;  %v1556_v23 = vadd.f32 %v1521_v21, %v321_v45  ;;  %v1525_v10 = vadd.f32 %v1524_v58, %v3006_v16  ;;  %v1611_v21 = vld [vmem:[#allocation8 + $0x80] sm:$0xff] (!%p1998_p6)  ;;  %v1613_v47 = vld [vmem:[#allocation8 + $0x90] sm:$0xff] (!%p1998_p6) }
 0x1f9   : > { %v1540_v60 = vadd.f32 %v2052_v48, %v305_v42  ;;  %v2054_v30 = vadd.f32 %v1484_v7, %v2980_v32  ;;  %1587 = vst [vmem:[#allocation8 + $0xe0] sm:$0xff] %v1555_v55  ;;  %v1557_v61 = vadd.f32 %v1523_v29, %v322_v51  ;;  %v1630_v0 = vshrl.u32 (!%p1998_p6), %v1629_v13, 7  ;;  %v1627_v32 = vld [vmem:[#allocation7] sm:$0x3] (!%p1998_p6)  ;;  %v1603_v25 = vld [vmem:[#allocation8 + $0x40] sm:$0xff] (!%p1998_p6) }
 0x1fa   : > { %1571 = vst [vmem:[#allocation8 + $0x60] sm:$0xff] %v1539_v54  ;;  %v1541_v53 = vadd.f32 %v2053_v22, %v306_v49  ;;  %1588 = vst [vmem:[#allocation8 + $0xe8] sm:$0xff] %v1556_v23  ;;  %v1558_v31 = vadd.f32 %v1525_v10, %v323_v57  ;;  %v1604_v12 = vld [vmem:[#allocation8 + $0x48] sm:$0xff] (!%p1998_p6)  ;;  %v1614_v22 = vld [vmem:[#allocation8 + $0x98] sm:$0xff] (!%p1998_p6) }
 0x1fb   : > { %1572 = vst [vmem:[#allocation8 + $0x68] sm:$0xff] %v1540_v60  ;;  %v1542_v63 = vadd.f32 %v2054_v30, %v307_v50  ;;  %1589 = vst [vmem:[#allocation8 + $0xf0] sm:$0xff] %v1557_v61  ;;  %v1631_v16 = vsub.s32 (!%p1998_p6), 0, %v1630_v0  ;;  %v1635_v17 = vsub.s32 (!%p1998_p6), 1, %v1630_v0  ;;  %v1605_v59 = vld [vmem:[#allocation8 + $0x50] sm:$0xff] (!%p1998_p6)  ;;  %v1612_v49 = vld [vmem:[#allocation8 + $0x88] sm:$0xff] (!%p1998_p6) }
 0x1fc   : > { %1573 = vst [vmem:[#allocation8 + $0x70] sm:$0xff] %v1541_v53  ;;  %1590 = vst [vmem:[#allocation8 + $0xf8] sm:$0xff] %v1558_v31  ;;  %v1606_v26 = vld [vmem:[#allocation8 + $0x58] sm:$0xff] (!%p1998_p6)  ;;  %v1615_v29 = vld [vmem:[#allocation8 + $0xa0] sm:$0xff] (!%p1998_p6) }
 0x1fd   : > { %1574 = vst [vmem:[#allocation8 + $0x78] sm:$0xff] %v1542_v63  ;;  %v3038_v5 = vrot.slane (!%p1998_p6), %v1627_v32, %v1631_v16  ;;  %v3040_v18 = vrot.slane (!%p1998_p6), %v1627_v32, %v1635_v17  ;;  %v1616_v50 = vld [vmem:[#allocation8 + $0xa8] sm:$0xff] (!%p1998_p6)  ;;  %v1617_v23 = vld [vmem:[#allocation8 + $0xb0] sm:$0xff] (!%p1998_p6)  ;;  %v1618_v30 = vld [vmem:[#allocation8 + $0xb8] sm:$0xff] (!%p1998_p6) }
 0x1fe   : > { %v1620_v16 = vld [vmem:[#allocation8 + $0xc8] sm:$0xff] }
 0x1ff   : > { %v1639_v9 = vadd.f32 %v3038_v5, %v1595_v24  ;;  %v1640_v19 = vadd.f32 %v3040_v18, %v1596_v56  ;;  %v1641_v41 = vadd.f32 %v3038_v5, %v1597_v35  ;;  %v1642_v11 = vadd.f32 %v3040_v18, %v1598_v2  ;;  %v1619_v24 = vld [vmem:[#allocation8 + $0xc0] sm:$0xff]  ;;  %v1621_v56 = vld [vmem:[#allocation8 + $0xd0] sm:$0xff] }
 0x200   : > { %v1643_v20 = vadd.f32 %v3038_v5, %v1599_v3  ;;  %v1644_v44 = vadd.f32 %v3040_v18, %v1600_v38  ;;  %v1645_v14 = vadd.f32 %v3038_v5, %v1601_v6  ;;  %v1646_v15 = vadd.f32 %v3040_v18, %v1602_v8  ;;  %v1622_v38 = vld [vmem:[#allocation8 + $0xd8] sm:$0xff]  ;;  %v1623_v6 = vld [vmem:[#allocation8 + $0xe0] sm:$0xff] }
 0x201   : > { %v1607_v62 = vld [vmem:[#allocation8 + $0x60] sm:$0xff]  ;;  %v1671_v34 = vmax.f32 %v1639_v9, 0.0  ;;  %v1672_v36 = vmax.f32 %v1640_v19, 0.0  ;;  %v1673_v27 = vmax.f32 %v1641_v41, 0.0  ;;  %v1674_v1 = vmax.f32 %v1642_v11, 0.0  ;;  %v1624_v8 = vld [vmem:[#allocation8 + $0xe8] sm:$0xff] }
 0x202   : > { %v1608_v33 = vld [vmem:[#allocation8 + $0x68] sm:$0xff]  ;;  %v1675_v40 = vmax.f32 %v1643_v20, 0.0  ;;  %v1676_v28 = vmax.f32 %v1644_v44, 0.0  ;;  %v1677_v4 = vmax.f32 %v1645_v14, 0.0  ;;  %v1678_v42 = vmax.f32 %v1646_v15, 0.0 }
 0x203   : > { %v1609_v37 = vld [vmem:[#allocation8 + $0x70] sm:$0xff]  ;;  %1703 = vst [vmem:[#allocation8] sm:$0xff] %v1671_v34  ;;  %1704 = vst [vmem:[#allocation8 + $0x8] sm:$0xff] %v1672_v36  ;;  %v1647_v43 = vadd.f32 %v3038_v5, %v1603_v25  ;;  %v1648_v45 = vadd.f32 %v3040_v18, %v1604_v12  ;;  %v1649_v46 = vadd.f32 %v3038_v5, %v1605_v59  ;;  %v1626_v12 = vld [vmem:[#allocation8 + $0xf8] sm:$0xff] }
 0x204   : > { %v1610_v39 = vld [vmem:[#allocation8 + $0x78] sm:$0xff]  ;;  %1705 = vst [vmem:[#allocation8 + $0x10] sm:$0xff] %v1673_v27  ;;  %1706 = vst [vmem:[#allocation8 + $0x18] sm:$0xff] %v1674_v1  ;;  %v1650_v48 = vadd.f32 %v3040_v18, %v1606_v26  ;;  %v1651_v51 = vadd.f32 %v3038_v5, %v1607_v62  ;;  %v1652_v52 = vadd.f32 %v3040_v18, %v1608_v33  ;;  %v1625_v25 = vld [vmem:[#allocation8 + $0xf0] sm:$0xff] }
 0x205   : > { %1707 = vst [vmem:[#allocation8 + $0x20] sm:$0xff] %v1675_v40  ;;  %1708 = vst [vmem:[#allocation8 + $0x28] sm:$0xff] %v1676_v28  ;;  %v1653_v54 = vadd.f32 %v3038_v5, %v1609_v37  ;;  %v1654_v55 = vadd.f32 %v3040_v18, %v1610_v39  ;;  %v1679_v7 = vmax.f32 %v1647_v43, 0.0  ;;  %v1680_v57 = vmax.f32 %v1648_v45, 0.0 }
 0x206   : > { %1709 = vst [vmem:[#allocation8 + $0x30] sm:$0xff] %v1677_v4  ;;  %1710 = vst [vmem:[#allocation8 + $0x38] sm:$0xff] %v1678_v42  ;;  %v1681_v58 = vmax.f32 %v1649_v46, 0.0  ;;  %v1682_v60 = vmax.f32 %v1650_v48, 0.0  ;;  %v1683_v10 = vmax.f32 %v1651_v51, 0.0  ;;  %v1684_v53 = vmax.f32 %v1652_v52, 0.0 }
 0x207   : > { %v1685_v61 = vmax.f32 %v1653_v54, 0.0  ;;  %v1686_v63 = vmax.f32 %v1654_v55, 0.0  ;;  %1711 = vst [vmem:[#allocation8 + $0x40] sm:$0xff] %v1679_v7  ;;  %1712 = vst [vmem:[#allocation8 + $0x48] sm:$0xff] %v1680_v57  ;;  %v1655_v31 = vadd.f32 %v3038_v5, %v1611_v21  ;;  %v1656_v13 = vadd.f32 %v3040_v18, %v1612_v49 }
 0x208   : > { %1713 = vst [vmem:[#allocation8 + $0x50] sm:$0xff] %v1681_v58  ;;  %1714 = vst [vmem:[#allocation8 + $0x58] sm:$0xff] %v1682_v60  ;;  %v1657_v0 = vadd.f32 %v3038_v5, %v1613_v47  ;;  %v1658_v32 = vadd.f32 %v3040_v18, %v1614_v22  ;;  %v1659_v17 = vadd.f32 %v3038_v5, %v1615_v29 }
 0x209   : > { %1715 = vst [vmem:[#allocation8 + $0x60] sm:$0xff] %v1683_v10  ;;  %1716 = vst [vmem:[#allocation8 + $0x68] sm:$0xff] %v1684_v53  ;;  %v1660_v35 = vadd.f32 %v3040_v18, %v1616_v50  ;;  %v1661_v2 = vadd.f32 %v3038_v5, %v1617_v23  ;;  %v1662_v3 = vadd.f32 %v3040_v18, %v1618_v30  ;;  %v1687_v9 = vmax.f32 %v1655_v31, 0.0 }
 0x20a   : > { %1717 = vst [vmem:[#allocation8 + $0x70] sm:$0xff] %v1685_v61  ;;  %1718 = vst [vmem:[#allocation8 + $0x78] sm:$0xff] %v1686_v63  ;;  %v1688_v19 = vmax.f32 %v1656_v13, 0.0  ;;  %v1689_v41 = vmax.f32 %v1657_v0, 0.0  ;;  %v1690_v11 = vmax.f32 %v1658_v32, 0.0  ;;  %v1691_v59 = vmax.f32 %v1659_v17, 0.0 }
 0x20b   : > { %v1692_v20 = vmax.f32 %v1660_v35, 0.0  ;;  %v1693_v44 = vmax.f32 %v1661_v2, 0.0  ;;  %v1694_v14 = vmax.f32 %v1662_v3, 0.0  ;;  %1719 = vst [vmem:[#allocation8 + $0x80] sm:$0xff] %v1687_v9  ;;  %v1663_v15 = vadd.f32 %v3038_v5, %v1619_v24 }
 0x20c   : > { %1720 = vst [vmem:[#allocation8 + $0x88] sm:$0xff] %v1688_v19  ;;  %1721 = vst [vmem:[#allocation8 + $0x90] sm:$0xff] %v1689_v41  ;;  %v1664_v26 = vadd.f32 %v3040_v18, %v1620_v16  ;;  %v1665_v62 = vadd.f32 %v3038_v5, %v1621_v56  ;;  %v1666_v33 = vadd.f32 %v3040_v18, %v1622_v38 }
 0x20d   : > { %1722 = vst [vmem:[#allocation8 + $0x98] sm:$0xff] %v1690_v11  ;;  %1723 = vst [vmem:[#allocation8 + $0xa0] sm:$0xff] %v1691_v59  ;;  %v1667_v34 = vadd.f32 %v3038_v5, %v1623_v6  ;;  %v1668_v36 = vadd.f32 %v3040_v18, %v1624_v8  ;;  %v1669_v27 = vadd.f32 %v3038_v5, %v1625_v25  ;;  %v1695_v37 = vmax.f32 %v1663_v15, 0.0 }
 0x20e   : > { %1724 = vst [vmem:[#allocation8 + $0xa8] sm:$0xff] %v1692_v20  ;;  %1725 = vst [vmem:[#allocation8 + $0xb0] sm:$0xff] %v1693_v44  ;;  %v1670_v1 = vadd.f32 %v3040_v18, %v1626_v12  ;;  %v1696_v39 = vmax.f32 %v1664_v26, 0.0  ;;  %v1697_v40 = vmax.f32 %v1665_v62, 0.0  ;;  %v1698_v28 = vmax.f32 %v1666_v33, 0.0 }
 0x20f   : > { %1726 = vst [vmem:[#allocation8 + $0xb8] sm:$0xff] %v1694_v14  ;;  %v1699_v4 = vmax.f32 %v1667_v34, 0.0  ;;  %v1700_v42 = vmax.f32 %v1668_v36, 0.0  ;;  %v1701_v43 = vmax.f32 %v1669_v27, 0.0  ;;  %1727 = vst [vmem:[#allocation8 + $0xc0] sm:$0xff] %v1695_v37 }
 0x210   : > { %v1702_v45 = vmax.f32 %v1670_v1, 0.0  ;;  %1728 = vst [vmem:[#allocation8 + $0xc8] sm:$0xff] %v1696_v39  ;;  %1729 = vst [vmem:[#allocation8 + $0xd0] sm:$0xff] %v1697_v40 }
 0x211   : > { %1730 = vst [vmem:[#allocation8 + $0xd8] sm:$0xff] %v1698_v28  ;;  %1731 = vst [vmem:[#allocation8 + $0xe0] sm:$0xff] %v1699_v4 }
 0x212   : > { %1732 = vst [vmem:[#allocation8 + $0xe8] sm:$0xff] %v1700_v42  ;;  %1733 = vst [vmem:[#allocation8 + $0xf0] sm:$0xff] %v1701_v43 }
 0x213   : > { %1734 = vst [vmem:[#allocation8 + $0xf8] sm:$0xff] %v1702_v45 }
 0x214 PF: > { %p2133_p8 = scmp.eq.s32.totalorder %s2648_s18, 8  ;;  %s2596_s15 = smov [#allocation8]  }
 0x215   : > { %s1745_s20 = sshll.u32 %s2596_s15, 4  ;;  %s1746_s20 = int_to_ptr.vmem [resolvable:$true] %s1745_s20 }
 0x216   : > { %s2497_s21 = scalar_lea.vmem %s1746_s20, 4096  ;;  %p2504_p0 = scmp.lt.s32.totalorder %s1746_s20, %s1746_s20 }
 0x217   : > { %p2498_p13 = scmp.ne.s32.totalorder %s1746_s20, %s2497_s21  ;;  %p2505_p5 = scmp.lt.s32.totalorder %s2497_s21, %s2497_s21 }
 0x219   : > { %p2499_p1 = pnand %p2498_p13, %p2133_p8  ;;  %p2506_p7 = por %p2505_p5, %p2504_p0 }
 0x21b   : > { %p2500_p2 = pneg %p2499_p1 }
 0x21d   : > { %p2507_p9 = pnand %p2506_p7, %p2500_p2 }
 0x21f   : > { %2510 = shalt.err (!%p2507_p9)
}
 0x220   : > { %s2511_s5 = scalar_lea.hbm %s3118_s3, 4096 }
 0x221   : > { %p2512_p12 = scmp.ne.s32.totalorder %s3118_s3, %s2511_s5  ;;  %p2517_p10 = scmp.lt.u32.totalorder %s2511_s5, %s3118_s3 }
 0x223   : > { %p2513_p4 = pnand %p2512_p12, %p2133_p8 }
 0x225   : > { %p2514_p11 = pneg %p2513_p4 }
 0x227   : > { %p2519_p3 = pnand %p2517_p10, %p2514_p11 }
 0x229   : > { %2522 = shalt.err (!%p2519_p3)
}
 0x22a   : > { %s2597_s8 = smov 256   ;;  %s2598_s0 = smov 16  }
 0x22b   : > { %2116 = dma.vmem_to_hbm [thread:$0]  (%p2133_p8), %s1746_s20, 4096, %s3118_s3, [#allocation4], %s2597_s8, %s2597_s8, %s2598_s0  }
 0x22c   : > { %2560 = dma.done.wait (%p2133_p8), [#allocation4], 4096  }
 0x22d   : > { %2562 = vsyncadd (%p2133_p8), [#allocation4], 4294963200 }
 0x22e PF: > { %s20_s17 = sadd.s32 1, %s2585_s17   ;;  %s3134_s12 = smov %s2569_s13 }
 0x22f   : > { %p17_p6 = scmp.ge.s32.totalorder %s20_s17, 11   ;;  %s3135_s13 = smov %s2573_s14 }
 0x230   : > { %s3136_s14 = smov %s2718_s4  ;;  %s3137_s15 = smov %s2581_s16 }
 0x231   : > { %s3138_s16 = smov %s3140_s10  ;;  %19 = sbr.rel (!%p17_p6) target bundleno = 9 (0x9), region = 95 }
 0x238   :  { %1761 = vsyncpa [#allocation3], 1 }
 0x239   :  { %1763 = vsyncpa [#allocation3 + $0x1], 1 }
 0x23a   :  { %1764 = vsyncpa [#allocation6], 1 }
 0x23b   :  { %1766 = vsyncpa [#allocation6 + $0x1], 1 }
 0x23c   :  { %1767 = vsyncpa [#allocation4], 1 }
 0x23d   :  { %1769 = vsyncpa [#allocation4 + $0x1], 1 }

</bundles_post_ra>
